<compile_context>
chip_gen: v7x
topology: tpu7x:2x2x1
jax: 0.10.0
libtpu: 0.0.40
codegen_flags: <defaults>
</compile_context>

<pallas_src>
import functools

import jax
import jax.numpy as jnp
from jax.experimental import pallas as pl
from jax.experimental.pallas import tpu as pltpu

# ------------------------- model config (synthetic) -------------------------
BATCH = 2
SEQ = 8
HIDDEN = 128          # real SentenceBERT: 768
NUM_HEADS = 4
HEAD_DIM = HIDDEN // NUM_HEADS
FFN = 256
NUM_LAYERS = 2
VOCAB = 100
SCALE = 1.0 / (HEAD_DIM ** 0.5)   # folded into Wq at init time
LN_EPS = 1e-12


# ------------------------------ kernel helpers ------------------------------
def _layernorm_bf16(x, gamma, beta, eps=LN_EPS):
    # LN math in f32 (x may arrive as f32 from a residual add), cast once on write.
    x = x.astype(jnp.float32)
    mu = jnp.mean(x, axis=-1, keepdims=True)
    var = jnp.mean((x - mu) * (x - mu), axis=-1, keepdims=True)
    y = (x - mu) * jax.lax.rsqrt(var + eps) * gamma + beta
    return y.astype(jnp.bfloat16)


def _full_spec(arr):
    # Whole-array block, constant block index -> resident in VMEM, no re-DMA.
    nd = arr.ndim
    return pl.BlockSpec(arr.shape, lambda i, _nd=nd: (0,) * _nd)


# ------------------------------- fused kernel --------------------------------
def fused_encoder_kernel(x_ref, attn_bias_ref, pool_mask_ref,
                         emb_g_ref, emb_b_ref,
                         wqkv_ref, bqkv_ref, wo_ref, bo_ref,
                         ln1_g_ref, ln1_b_ref,
                         w1_ref, b1_ref, w2_ref, b2_ref,
                         ln2_g_ref, ln2_b_ref,
                         o_ref):
    # x_ref: (B*S, H) f32  -- whole batch flattened, one grid step.
    # attn_bias_ref: (B*S, B*S) f32 additive bias (0 inside batch & valid key,
    #                -1e9 for cross-batch or padded keys).
    # pool_mask_ref: (B, B*S) f32 block-diagonal masked-mean-pool matrix.
    bs = BATCH * SEQ

    # Embedding layernorm; activation stream is bf16 from here on.
    x = _layernorm_bf16(x_ref[...], emb_g_ref[...], emb_b_ref[...])      # (BS, H) bf16
    attn_bias = attn_bias_ref[...]                                        # (BS, BS) f32

    # Static unroll over encoder layers; stacked weights indexed with constant l.
    for l in range(NUM_LAYERS):
        # ---- fused QKV matmul (M = B*S = 16 rows, one MXU pass) ----
        qkv = jnp.dot(x, wqkv_ref[l],
                      preferred_element_type=jnp.float32) + bqkv_ref[l]   # (BS, 3H) f32

        # ---- per-head attention via free lane slices (no transposes) ----
        ctx_heads = []
        for h in range(NUM_HEADS):
            q_h = qkv[:, h * HEAD_DIM:(h + 1) * HEAD_DIM].astype(jnp.bfloat16)
            k_h = qkv[:, HIDDEN + h * HEAD_DIM: HIDDEN + (h + 1) * HEAD_DIM].astype(jnp.bfloat16)
            v_h = qkv[:, 2 * HIDDEN + h * HEAD_DIM: 2 * HIDDEN + (h + 1) * HEAD_DIM].astype(jnp.bfloat16)

            # scores = q_h @ k_h^T without materializing the transpose:
            # contract last dims of both operands. SCALE already folded into Wq.
            s = jax.lax.dot_general(q_h, k_h, (((1,), (1,)), ((), ())),
                                    preferred_element_type=jnp.float32)   # (BS, BS)
            s = s + attn_bias
            s = s - jnp.max(s, axis=-1, keepdims=True)
            p = jnp.exp(s)
            p = p * pl.reciprocal(jnp.sum(p, axis=-1, keepdims=True), approx=True)

            ctx_heads.append(jnp.dot(p.astype(jnp.bfloat16), v_h,
                                     preferred_element_type=jnp.float32))  # (BS, HD)

        ctx = jnp.concatenate(ctx_heads, axis=-1).astype(jnp.bfloat16)     # (BS, H)

        attn_out = jnp.dot(ctx, wo_ref[l],
                           preferred_element_type=jnp.float32) + bo_ref[l]
        x1 = _layernorm_bf16(x + attn_out, ln1_g_ref[l], ln1_b_ref[l])     # bf16

        # ---- feed-forward ----
        hid = jnp.dot(x1, w1_ref[l],
                      preferred_element_type=jnp.float32) + b1_ref[l]      # (BS, FFN) f32
        hid = jax.nn.gelu(hid, approximate=True).astype(jnp.bfloat16)
        ff = jnp.dot(hid, w2_ref[l],
                     preferred_element_type=jnp.float32) + b2_ref[l]       # (BS, H) f32
        x = _layernorm_bf16(x1 + ff, ln2_g_ref[l], ln2_b_ref[l])           # bf16

    # ---- SentenceBERT masked mean pooling: one (B, BS) x (BS, H) matmul ----
    pool_mask = pool_mask_ref[...]                                         # (B, BS) f32
    summed = jnp.dot(pool_mask.astype(jnp.bfloat16), x,
                     preferred_element_type=jnp.float32)                   # (B, H)
    denom = jnp.maximum(jnp.sum(pool_mask, axis=-1, keepdims=True), 1e-9)  # (B, 1)
    # exact divide here (one-off) to avoid compounding the approx-reciprocal error
    o_ref[...] = (summed / denom).astype(o_ref.dtype)


# ------------------------------ Python wrapper --------------------------------
WEIGHT_KEYS = ("emb_ln_g", "emb_ln_b",
               "wqkv", "bqkv", "wo", "bo",
               "ln1_g", "ln1_b",
               "w1", "b1", "w2", "b2",
               "ln2_g", "ln2_b")


def sbert_fused_forward(x_emb, attn_mask, params):
    """x_emb: (B, S, H) f32, attn_mask: (B, S) f32 -> (B, H) f32."""
    B, S, H = x_emb.shape
    BS = B * S
    x_flat = x_emb.reshape(BS, H).astype(jnp.float32)
    mask_flat = attn_mask.reshape(BS).astype(jnp.float32)

    # Additive attention bias: same-batch AND valid key -> 0, else -1e9.
    batch_ids = jnp.repeat(jnp.arange(B, dtype=jnp.int32), S)              # (BS,)
    same_batch = batch_ids[:, None] == batch_ids[None, :]                  # (BS, BS)
    key_valid = mask_flat[None, :] > 0.5                                   # (1, BS)
    attn_bias = jnp.where(same_batch & key_valid, 0.0, -1e9).astype(jnp.float32)

    # Block-diagonal masked-mean-pool matrix: pool_mask[b, b*S + s] = mask[b, s].
    pool_mask = ((batch_ids[None, :] == jnp.arange(B, dtype=jnp.int32)[:, None])
                 .astype(jnp.float32) * mask_flat[None, :])                # (B, BS)

    weights = [params[k] for k in WEIGHT_KEYS]
    in_specs = ([_full_spec(x_flat), _full_spec(attn_bias), _full_spec(pool_mask)]
                + [_full_spec(w) for w in weights])

    pooled = pl.pallas_call(
        fused_encoder_kernel,
        out_shape=jax.ShapeDtypeStruct((B, H), jnp.float32),
        grid=(1,),                                   # single step: whole batch at once
        in_specs=in_specs,
        out_specs=pl.BlockSpec((B, H), lambda i: (0, 0)),
        compiler_params=pltpu.CompilerParams(
            dimension_semantics=("arbitrary",),
            vmem_limit_bytes=32 * 1024 * 1024),
    )(x_flat, attn_bias, pool_mask, *weights)
    return pooled


# ------------------------------ parameter setup ------------------------------
def init_params(key):
    def nrm(k, shape, std=0.02):
        return (std * jax.random.normal(k, shape)).astype(jnp.float32)

    keys = jax.random.split(key, 2 + NUM_LAYERS * 6)
    params = {
        "word_emb": nrm(keys[0], (VOCAB, HIDDEN)),
        "pos_emb": nrm(keys[1], (SEQ, HIDDEN)),
        "emb_ln_g": jnp.ones((1, HIDDEN), jnp.float32),
        "emb_ln_b": jnp.zeros((1, HIDDEN), jnp.float32),
    }
    wqkv, wo, w1, w2 = [], [], [], []
    for l in range(NUM_LAYERS):
        kk = keys[2 + l * 6: 2 + (l + 1) * 6]
        # Fold the 1/sqrt(head_dim) attention scale into Wq (zero runtime cost).
        wq = nrm(kk[0], (HIDDEN, HIDDEN)) * SCALE
        wk = nrm(kk[1], (HIDDEN, HIDDEN))
        wv = nrm(kk[2], (HIDDEN, HIDDEN))
        wqkv.append(jnp.concatenate([wq, wk, wv], axis=1))   # (H, 3H)
        wo.append(nrm(kk[3], (HIDDEN, HIDDEN)))
        w1.append(nrm(kk[4], (HIDDEN, FFN)))
        w2.append(nrm(kk[5], (FFN, HIDDEN)))

    # Matmul weights in bf16 (MXU-native, half the DMA bytes); biases & LN in f32.
    params["wqkv"] = jnp.stack(wqkv).astype(jnp.bfloat16)               # (L, H, 3H)
    params["bqkv"] = jnp.zeros((NUM_LAYERS, 1, 3 * HIDDEN), jnp.float32)  # (q-bias would also need *SCALE if nonzero)
    params["wo"] = jnp.stack(wo).astype(jnp.bfloat16)                   # (L, H, H)
    params["bo"] = jnp.zeros((NUM_LAYERS, 1, HIDDEN), jnp.float32)
    params["ln1_g"] = jnp.ones((NUM_LAYERS, 1, HIDDEN), jnp.float32)
    params["ln1_b"] = jnp.zeros((NUM_LAYERS, 1, HIDDEN), jnp.float32)
    params["w1"] = jnp.stack(w1).astype(jnp.bfloat16)                   # (L, H, FFN)
    params["b1"] = jnp.zeros((NUM_LAYERS, 1, FFN), jnp.float32)
    params["w2"] = jnp.stack(w2).astype(jnp.bfloat16)                   # (L, FFN, H)
    params["b2"] = jnp.zeros((NUM_LAYERS, 1, HIDDEN), jnp.float32)
    params["ln2_g"] = jnp.ones((NUM_LAYERS, 1, HIDDEN), jnp.float32)
    params["ln2_b"] = jnp.zeros((NUM_LAYERS, 1, HIDDEN), jnp.float32)
    return params


# -------------------------------- full forward -------------------------------
@functools.partial(jax.jit, static_argnums=())
def sentence_bert_encode(token_ids, attn_mask, params):
    """token_ids: (B, S) int32, attn_mask: (B, S) f32 -> (B, HIDDEN) f32."""
    # Embedding lookup + positional add (glue, plain JAX gather).
    x = jnp.take(params["word_emb"], token_ids, axis=0) + params["pos_emb"][None, :, :]
    return sbert_fused_forward(x.astype(jnp.float32), attn_mask, params)


if __name__ == "__main__":
    key = jax.random.PRNGKey(0)
    k_param, k_tok = jax.random.split(key)

    params = init_params(k_param)

    # "captions" -> pre-tokenized deterministic ids + padding mask.
    token_ids = jax.random.randint(k_tok, (BATCH, SEQ), 0, VOCAB, dtype=jnp.int32)
    lengths = jnp.array([SEQ, 5], dtype=jnp.int32)                       # second caption padded
    attn_mask = (jnp.arange(SEQ)[None, :] < lengths[:, None]).astype(jnp.float32)  # (B, S)

    emb = sentence_bert_encode(token_ids, attn_mask, params)
    emb = jax.block_until_ready(emb)
    assert emb.shape == (BATCH, HIDDEN) and emb.dtype == jnp.float32
    assert bool(jnp.all(jnp.isfinite(emb)))
    print("KERNEL_OK")
</pallas_src>

<mosaic_0001>
module attributes {stable_mosaic.version = 11 : i64} {
  func.func @fused_encoder_kernel(%arg0: i32, %arg1: memref<16x128xf32, #tpu.memory_space<vmem>>, %arg2: memref<16x16xf32, #tpu.memory_space<vmem>>, %arg3: memref<2x16xf32, #tpu.memory_space<vmem>>, %arg4: memref<1x128xf32, #tpu.memory_space<vmem>>, %arg5: memref<1x128xf32, #tpu.memory_space<vmem>>, %arg6: memref<2x128x384xbf16, #tpu.memory_space<vmem>>, %arg7: memref<2x1x384xf32, #tpu.memory_space<vmem>>, %arg8: memref<2x128x128xbf16, #tpu.memory_space<vmem>>, %arg9: memref<2x1x128xf32, #tpu.memory_space<vmem>>, %arg10: memref<2x1x128xf32, #tpu.memory_space<vmem>>, %arg11: memref<2x1x128xf32, #tpu.memory_space<vmem>>, %arg12: memref<2x128x256xbf16, #tpu.memory_space<vmem>>, %arg13: memref<2x1x256xf32, #tpu.memory_space<vmem>>, %arg14: memref<2x256x128xbf16, #tpu.memory_space<vmem>>, %arg15: memref<2x1x128xf32, #tpu.memory_space<vmem>>, %arg16: memref<2x1x128xf32, #tpu.memory_space<vmem>>, %arg17: memref<2x1x128xf32, #tpu.memory_space<vmem>>, %arg18: memref<2x128xf32, #tpu.memory_space<vmem>>) attributes {dimension_semantics = [#tpu.dimension_semantics<arbitrary>], iteration_bounds = array<i64: 1>, scalar_prefetch = 0 : i64, scratch_operands = 0 : i64, tpu.core_type = #tpu.core_type<tc>, window_params = [{pipeline_mode = #tpu.pipeline_mode<synchronous>, transform_indices = @transform_0, window_bounds = array<i64: 16, 128>}, {pipeline_mode = #tpu.pipeline_mode<synchronous>, transform_indices = @transform_1, window_bounds = array<i64: 16, 16>}, {pipeline_mode = #tpu.pipeline_mode<synchronous>, transform_indices = @transform_2, window_bounds = array<i64: 2, 16>}, {pipeline_mode = #tpu.pipeline_mode<synchronous>, transform_indices = @transform_3, window_bounds = array<i64: 1, 128>}, {pipeline_mode = #tpu.pipeline_mode<synchronous>, transform_indices = @transform_4, window_bounds = array<i64: 1, 128>}, {pipeline_mode = #tpu.pipeline_mode<synchronous>, transform_indices = @transform_5, window_bounds = array<i64: 2, 128, 384>}, {pipeline_mode = #tpu.pipeline_mode<synchronous>, transform_indices = @transform_6, window_bounds = array<i64: 2, 1, 384>}, {pipeline_mode = #tpu.pipeline_mode<synchronous>, transform_indices = @transform_7, window_bounds = array<i64: 2, 128, 128>}, {pipeline_mode = #tpu.pipeline_mode<synchronous>, transform_indices = @transform_8, window_bounds = array<i64: 2, 1, 128>}, {pipeline_mode = #tpu.pipeline_mode<synchronous>, transform_indices = @transform_9, window_bounds = array<i64: 2, 1, 128>}, {pipeline_mode = #tpu.pipeline_mode<synchronous>, transform_indices = @transform_10, window_bounds = array<i64: 2, 1, 128>}, {pipeline_mode = #tpu.pipeline_mode<synchronous>, transform_indices = @transform_11, window_bounds = array<i64: 2, 128, 256>}, {pipeline_mode = #tpu.pipeline_mode<synchronous>, transform_indices = @transform_12, window_bounds = array<i64: 2, 1, 256>}, {pipeline_mode = #tpu.pipeline_mode<synchronous>, transform_indices = @transform_13, window_bounds = array<i64: 2, 256, 128>}, {pipeline_mode = #tpu.pipeline_mode<synchronous>, transform_indices = @transform_14, window_bounds = array<i64: 2, 1, 128>}, {pipeline_mode = #tpu.pipeline_mode<synchronous>, transform_indices = @transform_15, window_bounds = array<i64: 2, 1, 128>}, {pipeline_mode = #tpu.pipeline_mode<synchronous>, transform_indices = @transform_16, window_bounds = array<i64: 2, 1, 128>}, {pipeline_mode = #tpu.pipeline_mode<synchronous>, transform_indices = @transform_17, window_bounds = array<i64: 2, 128>}]} {
    %c0 = arith.constant 0 : index
    %c0_0 = arith.constant 0 : index
    %0 = vector.load %arg1[%c0, %c0_0] : memref<16x128xf32, #tpu.memory_space<vmem>>, vector<16x128xf32>
    %c0_1 = arith.constant 0 : index
    %c0_2 = arith.constant 0 : index
    %1 = vector.load %arg4[%c0_1, %c0_2] : memref<1x128xf32, #tpu.memory_space<vmem>>, vector<1x128xf32>
    %c0_3 = arith.constant 0 : index
    %c0_4 = arith.constant 0 : index
    %2 = vector.load %arg5[%c0_3, %c0_4] : memref<1x128xf32, #tpu.memory_space<vmem>>, vector<1x128xf32>
    %cst = arith.constant dense<0.000000e+00> : vector<16xf32>
    %3 = vector.multi_reduction <add>, %0, %cst [1] : vector<16x128xf32> to vector<16xf32>
    %4 = vector.shape_cast %3 : vector<16xf32> to vector<16x1xf32>
    %cst_5 = arith.constant 1.280000e+02 : f32
    %5 = vector.broadcast %cst_5 : f32 to vector<16x1xf32>
    %6 = arith.divf %4, %5 : vector<16x1xf32>
    %7 = vector.broadcast %6 : vector<16x1xf32> to vector<16x128xf32>
    %8 = arith.subf %0, %7 : vector<16x128xf32>
    %9 = vector.broadcast %6 : vector<16x1xf32> to vector<16x128xf32>
    %10 = arith.subf %0, %9 : vector<16x128xf32>
    %11 = arith.mulf %8, %10 : vector<16x128xf32>
    %cst_6 = arith.constant dense<0.000000e+00> : vector<16xf32>
    %12 = vector.multi_reduction <add>, %11, %cst_6 [1] : vector<16x128xf32> to vector<16xf32>
    %13 = vector.shape_cast %12 : vector<16xf32> to vector<16x1xf32>
    %cst_7 = arith.constant 1.280000e+02 : f32
    %14 = vector.broadcast %cst_7 : f32 to vector<16x1xf32>
    %15 = arith.divf %13, %14 : vector<16x1xf32>
    %16 = vector.broadcast %6 : vector<16x1xf32> to vector<16x128xf32>
    %17 = arith.subf %0, %16 : vector<16x128xf32>
    %cst_8 = arith.constant 9.99999996E-13 : f32
    %18 = vector.broadcast %cst_8 : f32 to vector<16x1xf32>
    %19 = arith.addf %15, %18 : vector<16x1xf32>
    %20 = math.rsqrt %19 : vector<16x1xf32>
    %21 = vector.broadcast %20 : vector<16x1xf32> to vector<16x128xf32>
    %22 = arith.mulf %17, %21 : vector<16x128xf32>
    %23 = vector.broadcast %1 : vector<1x128xf32> to vector<16x128xf32>
    %24 = arith.mulf %22, %23 : vector<16x128xf32>
    %25 = vector.broadcast %2 : vector<1x128xf32> to vector<16x128xf32>
    %26 = arith.addf %24, %25 : vector<16x128xf32>
    %27 = arith.truncf %26 : vector<16x128xf32> to vector<16x128xbf16>
    %c0_9 = arith.constant 0 : index
    %c0_10 = arith.constant 0 : index
    %28 = vector.load %arg2[%c0_9, %c0_10] : memref<16x16xf32, #tpu.memory_space<vmem>>, vector<16x16xf32>
    %c0_11 = arith.constant 0 : index
    %c0_12 = arith.constant 0 : index
    %c0_13 = arith.constant 0 : index
    %29 = vector.load %arg6[%c0_11, %c0_12, %c0_13] : memref<2x128x384xbf16, #tpu.memory_space<vmem>>, vector<1x128x384xbf16>
    %30 = vector.shape_cast %29 : vector<1x128x384xbf16> to vector<128x384xbf16>
    %cst_14 = arith.constant dense<0.000000e+00> : vector<16x384xf32>
    %31 = tpu.matmul %27, %30, %cst_14 {dimension_numbers = #tpu.dot_dimension_numbers<[1], [0], [0], [1], [0, 0, 1, 1], [], []>} : vector<16x128xbf16>, vector<128x384xbf16>, vector<16x384xf32> -> vector<16x384xf32>
    %c0_15 = arith.constant 0 : index
    %c0_16 = arith.constant 0 : index
    %c0_17 = arith.constant 0 : index
    %32 = vector.load %arg7[%c0_15, %c0_16, %c0_17] : memref<2x1x384xf32, #tpu.memory_space<vmem>>, vector<1x1x384xf32>
    %33 = vector.shape_cast %32 : vector<1x1x384xf32> to vector<1x384xf32>
    %34 = vector.broadcast %33 : vector<1x384xf32> to vector<16x384xf32>
    %35 = arith.addf %31, %34 : vector<16x384xf32>
    %36 = vector.extract_strided_slice %35 {offsets = [0, 0], sizes = [16, 32], strides = [1, 1]} : vector<16x384xf32> to vector<16x32xf32>
    %37 = arith.truncf %36 : vector<16x32xf32> to vector<16x32xbf16>
    %38 = vector.extract_strided_slice %35 {offsets = [0, 128], sizes = [16, 32], strides = [1, 1]} : vector<16x384xf32> to vector<16x32xf32>
    %39 = arith.truncf %38 : vector<16x32xf32> to vector<16x32xbf16>
    %40 = vector.extract_strided_slice %35 {offsets = [0, 256], sizes = [16, 32], strides = [1, 1]} : vector<16x384xf32> to vector<16x32xf32>
    %41 = arith.truncf %40 : vector<16x32xf32> to vector<16x32xbf16>
    %cst_18 = arith.constant dense<0.000000e+00> : vector<16x16xf32>
    %42 = tpu.matmul %37, %39, %cst_18 {dimension_numbers = #tpu.dot_dimension_numbers<[1], [1], [0], [0], [0, 0, 1, 0], [], []>} : vector<16x32xbf16>, vector<16x32xbf16>, vector<16x16xf32> -> vector<16x16xf32>
    %43 = arith.addf %42, %28 : vector<16x16xf32>
    %cst_19 = arith.constant dense<0xFF800000> : vector<16xf32>
    %44 = vector.multi_reduction <maximumf>, %43, %cst_19 [1] : vector<16x16xf32> to vector<16xf32>
    %45 = vector.shape_cast %44 : vector<16xf32> to vector<16x1xf32>
    %46 = vector.broadcast %45 : vector<16x1xf32> to vector<16x16xf32>
    %47 = arith.subf %43, %46 : vector<16x16xf32>
    %48 = math.exp %47 : vector<16x16xf32>
    %cst_20 = arith.constant dense<0.000000e+00> : vector<16xf32>
    %49 = vector.multi_reduction <add>, %48, %cst_20 [1] : vector<16x16xf32> to vector<16xf32>
    %50 = vector.shape_cast %49 : vector<16xf32> to vector<16x1xf32>
    %51 = tpu.reciprocal %50 {approx = true} : vector<16x1xf32> -> vector<16x1xf32>
    %52 = vector.broadcast %51 : vector<16x1xf32> to vector<16x16xf32>
    %53 = arith.mulf %48, %52 : vector<16x16xf32>
    %54 = arith.truncf %53 : vector<16x16xf32> to vector<16x16xbf16>
    %cst_21 = arith.constant dense<0.000000e+00> : vector<16x32xf32>
    %55 = tpu.matmul %54, %41, %cst_21 {dimension_numbers = #tpu.dot_dimension_numbers<[1], [0], [0], [1], [0, 0, 1, 1], [], []>} : vector<16x16xbf16>, vector<16x32xbf16>, vector<16x32xf32> -> vector<16x32xf32>
    %56 = vector.extract_strided_slice %35 {offsets = [0, 32], sizes = [16, 32], strides = [1, 1]} : vector<16x384xf32> to vector<16x32xf32>
    %57 = arith.truncf %56 : vector<16x32xf32> to vector<16x32xbf16>
    %58 = vector.extract_strided_slice %35 {offsets = [0, 160], sizes = [16, 32], strides = [1, 1]} : vector<16x384xf32> to vector<16x32xf32>
    %59 = arith.truncf %58 : vector<16x32xf32> to vector<16x32xbf16>
    %60 = vector.extract_strided_slice %35 {offsets = [0, 288], sizes = [16, 32], strides = [1, 1]} : vector<16x384xf32> to vector<16x32xf32>
    %61 = arith.truncf %60 : vector<16x32xf32> to vector<16x32xbf16>
    %cst_22 = arith.constant dense<0.000000e+00> : vector<16x16xf32>
    %62 = tpu.matmul %57, %59, %cst_22 {dimension_numbers = #tpu.dot_dimension_numbers<[1], [1], [0], [0], [0, 0, 1, 0], [], []>} : vector<16x32xbf16>, vector<16x32xbf16>, vector<16x16xf32> -> vector<16x16xf32>
    %63 = arith.addf %62, %28 : vector<16x16xf32>
    %cst_23 = arith.constant dense<0xFF800000> : vector<16xf32>
    %64 = vector.multi_reduction <maximumf>, %63, %cst_23 [1] : vector<16x16xf32> to vector<16xf32>
    %65 = vector.shape_cast %64 : vector<16xf32> to vector<16x1xf32>
    %66 = vector.broadcast %65 : vector<16x1xf32> to vector<16x16xf32>
    %67 = arith.subf %63, %66 : vector<16x16xf32>
    %68 = math.exp %67 : vector<16x16xf32>
    %cst_24 = arith.constant dense<0.000000e+00> : vector<16xf32>
    %69 = vector.multi_reduction <add>, %68, %cst_24 [1] : vector<16x16xf32> to vector<16xf32>
    %70 = vector.shape_cast %69 : vector<16xf32> to vector<16x1xf32>
    %71 = tpu.reciprocal %70 {approx = true} : vector<16x1xf32> -> vector<16x1xf32>
    %72 = vector.broadcast %71 : vector<16x1xf32> to vector<16x16xf32>
    %73 = arith.mulf %68, %72 : vector<16x16xf32>
    %74 = arith.truncf %73 : vector<16x16xf32> to vector<16x16xbf16>
    %cst_25 = arith.constant dense<0.000000e+00> : vector<16x32xf32>
    %75 = tpu.matmul %74, %61, %cst_25 {dimension_numbers = #tpu.dot_dimension_numbers<[1], [0], [0], [1], [0, 0, 1, 1], [], []>} : vector<16x16xbf16>, vector<16x32xbf16>, vector<16x32xf32> -> vector<16x32xf32>
    %76 = vector.extract_strided_slice %35 {offsets = [0, 64], sizes = [16, 32], strides = [1, 1]} : vector<16x384xf32> to vector<16x32xf32>
    %77 = arith.truncf %76 : vector<16x32xf32> to vector<16x32xbf16>
    %78 = vector.extract_strided_slice %35 {offsets = [0, 192], sizes = [16, 32], strides = [1, 1]} : vector<16x384xf32> to vector<16x32xf32>
    %79 = arith.truncf %78 : vector<16x32xf32> to vector<16x32xbf16>
    %80 = vector.extract_strided_slice %35 {offsets = [0, 320], sizes = [16, 32], strides = [1, 1]} : vector<16x384xf32> to vector<16x32xf32>
    %81 = arith.truncf %80 : vector<16x32xf32> to vector<16x32xbf16>
    %cst_26 = arith.constant dense<0.000000e+00> : vector<16x16xf32>
    %82 = tpu.matmul %77, %79, %cst_26 {dimension_numbers = #tpu.dot_dimension_numbers<[1], [1], [0], [0], [0, 0, 1, 0], [], []>} : vector<16x32xbf16>, vector<16x32xbf16>, vector<16x16xf32> -> vector<16x16xf32>
    %83 = arith.addf %82, %28 : vector<16x16xf32>
    %cst_27 = arith.constant dense<0xFF800000> : vector<16xf32>
    %84 = vector.multi_reduction <maximumf>, %83, %cst_27 [1] : vector<16x16xf32> to vector<16xf32>
    %85 = vector.shape_cast %84 : vector<16xf32> to vector<16x1xf32>
    %86 = vector.broadcast %85 : vector<16x1xf32> to vector<16x16xf32>
    %87 = arith.subf %83, %86 : vector<16x16xf32>
    %88 = math.exp %87 : vector<16x16xf32>
    %cst_28 = arith.constant dense<0.000000e+00> : vector<16xf32>
    %89 = vector.multi_reduction <add>, %88, %cst_28 [1] : vector<16x16xf32> to vector<16xf32>
    %90 = vector.shape_cast %89 : vector<16xf32> to vector<16x1xf32>
    %91 = tpu.reciprocal %90 {approx = true} : vector<16x1xf32> -> vector<16x1xf32>
    %92 = vector.broadcast %91 : vector<16x1xf32> to vector<16x16xf32>
    %93 = arith.mulf %88, %92 : vector<16x16xf32>
    %94 = arith.truncf %93 : vector<16x16xf32> to vector<16x16xbf16>
    %cst_29 = arith.constant dense<0.000000e+00> : vector<16x32xf32>
    %95 = tpu.matmul %94, %81, %cst_29 {dimension_numbers = #tpu.dot_dimension_numbers<[1], [0], [0], [1], [0, 0, 1, 1], [], []>} : vector<16x16xbf16>, vector<16x32xbf16>, vector<16x32xf32> -> vector<16x32xf32>
    %96 = vector.extract_strided_slice %35 {offsets = [0, 96], sizes = [16, 32], strides = [1, 1]} : vector<16x384xf32> to vector<16x32xf32>
    %97 = arith.truncf %96 : vector<16x32xf32> to vector<16x32xbf16>
    %98 = vector.extract_strided_slice %35 {offsets = [0, 224], sizes = [16, 32], strides = [1, 1]} : vector<16x384xf32> to vector<16x32xf32>
    %99 = arith.truncf %98 : vector<16x32xf32> to vector<16x32xbf16>
    %100 = vector.extract_strided_slice %35 {offsets = [0, 352], sizes = [16, 32], strides = [1, 1]} : vector<16x384xf32> to vector<16x32xf32>
    %101 = arith.truncf %100 : vector<16x32xf32> to vector<16x32xbf16>
    %cst_30 = arith.constant dense<0.000000e+00> : vector<16x16xf32>
    %102 = tpu.matmul %97, %99, %cst_30 {dimension_numbers = #tpu.dot_dimension_numbers<[1], [1], [0], [0], [0, 0, 1, 0], [], []>} : vector<16x32xbf16>, vector<16x32xbf16>, vector<16x16xf32> -> vector<16x16xf32>
    %103 = arith.addf %102, %28 : vector<16x16xf32>
    %cst_31 = arith.constant dense<0xFF800000> : vector<16xf32>
    %104 = vector.multi_reduction <maximumf>, %103, %cst_31 [1] : vector<16x16xf32> to vector<16xf32>
    %105 = vector.shape_cast %104 : vector<16xf32> to vector<16x1xf32>
    %106 = vector.broadcast %105 : vector<16x1xf32> to vector<16x16xf32>
    %107 = arith.subf %103, %106 : vector<16x16xf32>
    %108 = math.exp %107 : vector<16x16xf32>
    %cst_32 = arith.constant dense<0.000000e+00> : vector<16xf32>
    %109 = vector.multi_reduction <add>, %108, %cst_32 [1] : vector<16x16xf32> to vector<16xf32>
    %110 = vector.shape_cast %109 : vector<16xf32> to vector<16x1xf32>
    %111 = tpu.reciprocal %110 {approx = true} : vector<16x1xf32> -> vector<16x1xf32>
    %112 = vector.broadcast %111 : vector<16x1xf32> to vector<16x16xf32>
    %113 = arith.mulf %108, %112 : vector<16x16xf32>
    %114 = arith.truncf %113 : vector<16x16xf32> to vector<16x16xbf16>
    %cst_33 = arith.constant dense<0.000000e+00> : vector<16x32xf32>
    %115 = tpu.matmul %114, %101, %cst_33 {dimension_numbers = #tpu.dot_dimension_numbers<[1], [0], [0], [1], [0, 0, 1, 1], [], []>} : vector<16x16xbf16>, vector<16x32xbf16>, vector<16x32xf32> -> vector<16x32xf32>
    %116 = tpu.concatenate %55, %75, %95, %115 in 1 : vector<16x32xf32>, vector<16x32xf32>, vector<16x32xf32>, vector<16x32xf32> -> vector<16x128xf32>
    %117 = arith.truncf %116 : vector<16x128xf32> to vector<16x128xbf16>
    %c0_34 = arith.constant 0 : index
    %c0_35 = arith.constant 0 : index
    %c0_36 = arith.constant 0 : index
    %118 = vector.load %arg8[%c0_34, %c0_35, %c0_36] : memref<2x128x128xbf16, #tpu.memory_space<vmem>>, vector<1x128x128xbf16>
    %119 = vector.shape_cast %118 : vector<1x128x128xbf16> to vector<128x128xbf16>
    %cst_37 = arith.constant dense<0.000000e+00> : vector<16x128xf32>
    %120 = tpu.matmul %117, %119, %cst_37 {dimension_numbers = #tpu.dot_dimension_numbers<[1], [0], [0], [1], [0, 0, 1, 1], [], []>} : vector<16x128xbf16>, vector<128x128xbf16>, vector<16x128xf32> -> vector<16x128xf32>
    %c0_38 = arith.constant 0 : index
    %c0_39 = arith.constant 0 : index
    %c0_40 = arith.constant 0 : index
    %121 = vector.load %arg9[%c0_38, %c0_39, %c0_40] : memref<2x1x128xf32, #tpu.memory_space<vmem>>, vector<1x1x128xf32>
    %122 = vector.shape_cast %121 : vector<1x1x128xf32> to vector<1x128xf32>
    %123 = vector.broadcast %122 : vector<1x128xf32> to vector<16x128xf32>
    %124 = arith.addf %120, %123 : vector<16x128xf32>
    %125 = arith.extf %27 : vector<16x128xbf16> to vector<16x128xf32>
    %126 = arith.addf %125, %124 : vector<16x128xf32>
    %c0_41 = arith.constant 0 : index
    %c0_42 = arith.constant 0 : index
    %c0_43 = arith.constant 0 : index
    %127 = vector.load %arg10[%c0_41, %c0_42, %c0_43] : memref<2x1x128xf32, #tpu.memory_space<vmem>>, vector<1x1x128xf32>
    %128 = vector.shape_cast %127 : vector<1x1x128xf32> to vector<1x128xf32>
    %c0_44 = arith.constant 0 : index
    %c0_45 = arith.constant 0 : index
    %c0_46 = arith.constant 0 : index
    %129 = vector.load %arg11[%c0_44, %c0_45, %c0_46] : memref<2x1x128xf32, #tpu.memory_space<vmem>>, vector<1x1x128xf32>
    %130 = vector.shape_cast %129 : vector<1x1x128xf32> to vector<1x128xf32>
    %cst_47 = arith.constant dense<0.000000e+00> : vector<16xf32>
    %131 = vector.multi_reduction <add>, %126, %cst_47 [1] : vector<16x128xf32> to vector<16xf32>
    %132 = vector.shape_cast %131 : vector<16xf32> to vector<16x1xf32>
    %cst_48 = arith.constant 1.280000e+02 : f32
    %133 = vector.broadcast %cst_48 : f32 to vector<16x1xf32>
    %134 = arith.divf %132, %133 : vector<16x1xf32>
    %135 = vector.broadcast %134 : vector<16x1xf32> to vector<16x128xf32>
    %136 = arith.subf %126, %135 : vector<16x128xf32>
    %137 = vector.broadcast %134 : vector<16x1xf32> to vector<16x128xf32>
    %138 = arith.subf %126, %137 : vector<16x128xf32>
    %139 = arith.mulf %136, %138 : vector<16x128xf32>
    %cst_49 = arith.constant dense<0.000000e+00> : vector<16xf32>
    %140 = vector.multi_reduction <add>, %139, %cst_49 [1] : vector<16x128xf32> to vector<16xf32>
    %141 = vector.shape_cast %140 : vector<16xf32> to vector<16x1xf32>
    %cst_50 = arith.constant 1.280000e+02 : f32
    %142 = vector.broadcast %cst_50 : f32 to vector<16x1xf32>
    %143 = arith.divf %141, %142 : vector<16x1xf32>
    %144 = vector.broadcast %134 : vector<16x1xf32> to vector<16x128xf32>
    %145 = arith.subf %126, %144 : vector<16x128xf32>
    %cst_51 = arith.constant 9.99999996E-13 : f32
    %146 = vector.broadcast %cst_51 : f32 to vector<16x1xf32>
    %147 = arith.addf %143, %146 : vector<16x1xf32>
    %148 = math.rsqrt %147 : vector<16x1xf32>
    %149 = vector.broadcast %148 : vector<16x1xf32> to vector<16x128xf32>
    %150 = arith.mulf %145, %149 : vector<16x128xf32>
    %151 = vector.broadcast %128 : vector<1x128xf32> to vector<16x128xf32>
    %152 = arith.mulf %150, %151 : vector<16x128xf32>
    %153 = vector.broadcast %130 : vector<1x128xf32> to vector<16x128xf32>
    %154 = arith.addf %152, %153 : vector<16x128xf32>
    %155 = arith.truncf %154 : vector<16x128xf32> to vector<16x128xbf16>
    %c0_52 = arith.constant 0 : index
    %c0_53 = arith.constant 0 : index
    %c0_54 = arith.constant 0 : index
    %156 = vector.load %arg12[%c0_52, %c0_53, %c0_54] : memref<2x128x256xbf16, #tpu.memory_space<vmem>>, vector<1x128x256xbf16>
    %157 = vector.shape_cast %156 : vector<1x128x256xbf16> to vector<128x256xbf16>
    %cst_55 = arith.constant dense<0.000000e+00> : vector<16x256xf32>
    %158 = tpu.matmul %155, %157, %cst_55 {dimension_numbers = #tpu.dot_dimension_numbers<[1], [0], [0], [1], [0, 0, 1, 1], [], []>} : vector<16x128xbf16>, vector<128x256xbf16>, vector<16x256xf32> -> vector<16x256xf32>
    %c0_56 = arith.constant 0 : index
    %c0_57 = arith.constant 0 : index
    %c0_58 = arith.constant 0 : index
    %159 = vector.load %arg13[%c0_56, %c0_57, %c0_58] : memref<2x1x256xf32, #tpu.memory_space<vmem>>, vector<1x1x256xf32>
    %160 = vector.shape_cast %159 : vector<1x1x256xf32> to vector<1x256xf32>
    %161 = vector.broadcast %160 : vector<1x256xf32> to vector<16x256xf32>
    %162 = arith.addf %158, %161 : vector<16x256xf32>
    %163 = arith.mulf %162, %162 : vector<16x256xf32>
    %164 = arith.mulf %162, %163 : vector<16x256xf32>
    %cst_59 = arith.constant 4.471500e-02 : f32
    %165 = vector.broadcast %cst_59 : f32 to vector<16x256xf32>
    %166 = arith.mulf %165, %164 : vector<16x256xf32>
    %167 = arith.addf %162, %166 : vector<16x256xf32>
    %cst_60 = arith.constant 0.797884583 : f32
    %168 = vector.broadcast %cst_60 : f32 to vector<16x256xf32>
    %169 = arith.mulf %168, %167 : vector<16x256xf32>
    %170 = math.tanh %169 : vector<16x256xf32>
    %cst_61 = arith.constant 1.000000e+00 : f32
    %171 = vector.broadcast %cst_61 : f32 to vector<16x256xf32>
    %172 = arith.addf %171, %170 : vector<16x256xf32>
    %cst_62 = arith.constant 5.000000e-01 : f32
    %173 = vector.broadcast %cst_62 : f32 to vector<16x256xf32>
    %174 = arith.mulf %173, %172 : vector<16x256xf32>
    %175 = arith.mulf %162, %174 : vector<16x256xf32>
    %176 = arith.truncf %175 : vector<16x256xf32> to vector<16x256xbf16>
    %c0_63 = arith.constant 0 : index
    %c0_64 = arith.constant 0 : index
    %c0_65 = arith.constant 0 : index
    %177 = vector.load %arg14[%c0_63, %c0_64, %c0_65] : memref<2x256x128xbf16, #tpu.memory_space<vmem>>, vector<1x256x128xbf16>
    %178 = vector.shape_cast %177 : vector<1x256x128xbf16> to vector<256x128xbf16>
    %cst_66 = arith.constant dense<0.000000e+00> : vector<16x128xf32>
    %179 = tpu.matmul %176, %178, %cst_66 {dimension_numbers = #tpu.dot_dimension_numbers<[1], [0], [0], [1], [0, 0, 1, 1], [], []>} : vector<16x256xbf16>, vector<256x128xbf16>, vector<16x128xf32> -> vector<16x128xf32>
    %c0_67 = arith.constant 0 : index
    %c0_68 = arith.constant 0 : index
    %c0_69 = arith.constant 0 : index
    %180 = vector.load %arg15[%c0_67, %c0_68, %c0_69] : memref<2x1x128xf32, #tpu.memory_space<vmem>>, vector<1x1x128xf32>
    %181 = vector.shape_cast %180 : vector<1x1x128xf32> to vector<1x128xf32>
    %182 = vector.broadcast %181 : vector<1x128xf32> to vector<16x128xf32>
    %183 = arith.addf %179, %182 : vector<16x128xf32>
    %184 = arith.extf %155 : vector<16x128xbf16> to vector<16x128xf32>
    %185 = arith.addf %184, %183 : vector<16x128xf32>
    %c0_70 = arith.constant 0 : index
    %c0_71 = arith.constant 0 : index
    %c0_72 = arith.constant 0 : index
    %186 = vector.load %arg16[%c0_70, %c0_71, %c0_72] : memref<2x1x128xf32, #tpu.memory_space<vmem>>, vector<1x1x128xf32>
    %187 = vector.shape_cast %186 : vector<1x1x128xf32> to vector<1x128xf32>
    %c0_73 = arith.constant 0 : index
    %c0_74 = arith.constant 0 : index
    %c0_75 = arith.constant 0 : index
    %188 = vector.load %arg17[%c0_73, %c0_74, %c0_75] : memref<2x1x128xf32, #tpu.memory_space<vmem>>, vector<1x1x128xf32>
    %189 = vector.shape_cast %188 : vector<1x1x128xf32> to vector<1x128xf32>
    %cst_76 = arith.constant dense<0.000000e+00> : vector<16xf32>
    %190 = vector.multi_reduction <add>, %185, %cst_76 [1] : vector<16x128xf32> to vector<16xf32>
    %191 = vector.shape_cast %190 : vector<16xf32> to vector<16x1xf32>
    %cst_77 = arith.constant 1.280000e+02 : f32
    %192 = vector.broadcast %cst_77 : f32 to vector<16x1xf32>
    %193 = arith.divf %191, %192 : vector<16x1xf32>
    %194 = vector.broadcast %193 : vector<16x1xf32> to vector<16x128xf32>
    %195 = arith.subf %185, %194 : vector<16x128xf32>
    %196 = vector.broadcast %193 : vector<16x1xf32> to vector<16x128xf32>
    %197 = arith.subf %185, %196 : vector<16x128xf32>
    %198 = arith.mulf %195, %197 : vector<16x128xf32>
    %cst_78 = arith.constant dense<0.000000e+00> : vector<16xf32>
    %199 = vector.multi_reduction <add>, %198, %cst_78 [1] : vector<16x128xf32> to vector<16xf32>
    %200 = vector.shape_cast %199 : vector<16xf32> to vector<16x1xf32>
    %cst_79 = arith.constant 1.280000e+02 : f32
    %201 = vector.broadcast %cst_79 : f32 to vector<16x1xf32>
    %202 = arith.divf %200, %201 : vector<16x1xf32>
    %203 = vector.broadcast %193 : vector<16x1xf32> to vector<16x128xf32>
    %204 = arith.subf %185, %203 : vector<16x128xf32>
    %cst_80 = arith.constant 9.99999996E-13 : f32
    %205 = vector.broadcast %cst_80 : f32 to vector<16x1xf32>
    %206 = arith.addf %202, %205 : vector<16x1xf32>
    %207 = math.rsqrt %206 : vector<16x1xf32>
    %208 = vector.broadcast %207 : vector<16x1xf32> to vector<16x128xf32>
    %209 = arith.mulf %204, %208 : vector<16x128xf32>
    %210 = vector.broadcast %187 : vector<1x128xf32> to vector<16x128xf32>
    %211 = arith.mulf %209, %210 : vector<16x128xf32>
    %212 = vector.broadcast %189 : vector<1x128xf32> to vector<16x128xf32>
    %213 = arith.addf %211, %212 : vector<16x128xf32>
    %214 = arith.truncf %213 : vector<16x128xf32> to vector<16x128xbf16>
    %c1 = arith.constant 1 : index
    %c0_81 = arith.constant 0 : index
    %c0_82 = arith.constant 0 : index
    %215 = vector.load %arg6[%c1, %c0_81, %c0_82] : memref<2x128x384xbf16, #tpu.memory_space<vmem>>, vector<1x128x384xbf16>
    %216 = vector.shape_cast %215 : vector<1x128x384xbf16> to vector<128x384xbf16>
    %cst_83 = arith.constant dense<0.000000e+00> : vector<16x384xf32>
    %217 = tpu.matmul %214, %216, %cst_83 {dimension_numbers = #tpu.dot_dimension_numbers<[1], [0], [0], [1], [0, 0, 1, 1], [], []>} : vector<16x128xbf16>, vector<128x384xbf16>, vector<16x384xf32> -> vector<16x384xf32>
    %c1_84 = arith.constant 1 : index
    %c0_85 = arith.constant 0 : index
    %c0_86 = arith.constant 0 : index
    %218 = vector.load %arg7[%c1_84, %c0_85, %c0_86] : memref<2x1x384xf32, #tpu.memory_space<vmem>>, vector<1x1x384xf32>
    %219 = vector.shape_cast %218 : vector<1x1x384xf32> to vector<1x384xf32>
    %220 = vector.broadcast %219 : vector<1x384xf32> to vector<16x384xf32>
    %221 = arith.addf %217, %220 : vector<16x384xf32>
    %222 = vector.extract_strided_slice %221 {offsets = [0, 0], sizes = [16, 32], strides = [1, 1]} : vector<16x384xf32> to vector<16x32xf32>
    %223 = arith.truncf %222 : vector<16x32xf32> to vector<16x32xbf16>
    %224 = vector.extract_strided_slice %221 {offsets = [0, 128], sizes = [16, 32], strides = [1, 1]} : vector<16x384xf32> to vector<16x32xf32>
    %225 = arith.truncf %224 : vector<16x32xf32> to vector<16x32xbf16>
    %226 = vector.extract_strided_slice %221 {offsets = [0, 256], sizes = [16, 32], strides = [1, 1]} : vector<16x384xf32> to vector<16x32xf32>
    %227 = arith.truncf %226 : vector<16x32xf32> to vector<16x32xbf16>
    %cst_87 = arith.constant dense<0.000000e+00> : vector<16x16xf32>
    %228 = tpu.matmul %223, %225, %cst_87 {dimension_numbers = #tpu.dot_dimension_numbers<[1], [1], [0], [0], [0, 0, 1, 0], [], []>} : vector<16x32xbf16>, vector<16x32xbf16>, vector<16x16xf32> -> vector<16x16xf32>
    %229 = arith.addf %228, %28 : vector<16x16xf32>
    %cst_88 = arith.constant dense<0xFF800000> : vector<16xf32>
    %230 = vector.multi_reduction <maximumf>, %229, %cst_88 [1] : vector<16x16xf32> to vector<16xf32>
    %231 = vector.shape_cast %230 : vector<16xf32> to vector<16x1xf32>
    %232 = vector.broadcast %231 : vector<16x1xf32> to vector<16x16xf32>
    %233 = arith.subf %229, %232 : vector<16x16xf32>
    %234 = math.exp %233 : vector<16x16xf32>
    %cst_89 = arith.constant dense<0.000000e+00> : vector<16xf32>
    %235 = vector.multi_reduction <add>, %234, %cst_89 [1] : vector<16x16xf32> to vector<16xf32>
    %236 = vector.shape_cast %235 : vector<16xf32> to vector<16x1xf32>
    %237 = tpu.reciprocal %236 {approx = true} : vector<16x1xf32> -> vector<16x1xf32>
    %238 = vector.broadcast %237 : vector<16x1xf32> to vector<16x16xf32>
    %239 = arith.mulf %234, %238 : vector<16x16xf32>
    %240 = arith.truncf %239 : vector<16x16xf32> to vector<16x16xbf16>
    %cst_90 = arith.constant dense<0.000000e+00> : vector<16x32xf32>
    %241 = tpu.matmul %240, %227, %cst_90 {dimension_numbers = #tpu.dot_dimension_numbers<[1], [0], [0], [1], [0, 0, 1, 1], [], []>} : vector<16x16xbf16>, vector<16x32xbf16>, vector<16x32xf32> -> vector<16x32xf32>
    %242 = vector.extract_strided_slice %221 {offsets = [0, 32], sizes = [16, 32], strides = [1, 1]} : vector<16x384xf32> to vector<16x32xf32>
    %243 = arith.truncf %242 : vector<16x32xf32> to vector<16x32xbf16>
    %244 = vector.extract_strided_slice %221 {offsets = [0, 160], sizes = [16, 32], strides = [1, 1]} : vector<16x384xf32> to vector<16x32xf32>
    %245 = arith.truncf %244 : vector<16x32xf32> to vector<16x32xbf16>
    %246 = vector.extract_strided_slice %221 {offsets = [0, 288], sizes = [16, 32], strides = [1, 1]} : vector<16x384xf32> to vector<16x32xf32>
    %247 = arith.truncf %246 : vector<16x32xf32> to vector<16x32xbf16>
    %cst_91 = arith.constant dense<0.000000e+00> : vector<16x16xf32>
    %248 = tpu.matmul %243, %245, %cst_91 {dimension_numbers = #tpu.dot_dimension_numbers<[1], [1], [0], [0], [0, 0, 1, 0], [], []>} : vector<16x32xbf16>, vector<16x32xbf16>, vector<16x16xf32> -> vector<16x16xf32>
    %249 = arith.addf %248, %28 : vector<16x16xf32>
    %cst_92 = arith.constant dense<0xFF800000> : vector<16xf32>
    %250 = vector.multi_reduction <maximumf>, %249, %cst_92 [1] : vector<16x16xf32> to vector<16xf32>
    %251 = vector.shape_cast %250 : vector<16xf32> to vector<16x1xf32>
    %252 = vector.broadcast %251 : vector<16x1xf32> to vector<16x16xf32>
    %253 = arith.subf %249, %252 : vector<16x16xf32>
    %254 = math.exp %253 : vector<16x16xf32>
    %cst_93 = arith.constant dense<0.000000e+00> : vector<16xf32>
    %255 = vector.multi_reduction <add>, %254, %cst_93 [1] : vector<16x16xf32> to vector<16xf32>
    %256 = vector.shape_cast %255 : vector<16xf32> to vector<16x1xf32>
    %257 = tpu.reciprocal %256 {approx = true} : vector<16x1xf32> -> vector<16x1xf32>
    %258 = vector.broadcast %257 : vector<16x1xf32> to vector<16x16xf32>
    %259 = arith.mulf %254, %258 : vector<16x16xf32>
    %260 = arith.truncf %259 : vector<16x16xf32> to vector<16x16xbf16>
    %cst_94 = arith.constant dense<0.000000e+00> : vector<16x32xf32>
    %261 = tpu.matmul %260, %247, %cst_94 {dimension_numbers = #tpu.dot_dimension_numbers<[1], [0], [0], [1], [0, 0, 1, 1], [], []>} : vector<16x16xbf16>, vector<16x32xbf16>, vector<16x32xf32> -> vector<16x32xf32>
    %262 = vector.extract_strided_slice %221 {offsets = [0, 64], sizes = [16, 32], strides = [1, 1]} : vector<16x384xf32> to vector<16x32xf32>
    %263 = arith.truncf %262 : vector<16x32xf32> to vector<16x32xbf16>
    %264 = vector.extract_strided_slice %221 {offsets = [0, 192], sizes = [16, 32], strides = [1, 1]} : vector<16x384xf32> to vector<16x32xf32>
    %265 = arith.truncf %264 : vector<16x32xf32> to vector<16x32xbf16>
    %266 = vector.extract_strided_slice %221 {offsets = [0, 320], sizes = [16, 32], strides = [1, 1]} : vector<16x384xf32> to vector<16x32xf32>
    %267 = arith.truncf %266 : vector<16x32xf32> to vector<16x32xbf16>
    %cst_95 = arith.constant dense<0.000000e+00> : vector<16x16xf32>
    %268 = tpu.matmul %263, %265, %cst_95 {dimension_numbers = #tpu.dot_dimension_numbers<[1], [1], [0], [0], [0, 0, 1, 0], [], []>} : vector<16x32xbf16>, vector<16x32xbf16>, vector<16x16xf32> -> vector<16x16xf32>
    %269 = arith.addf %268, %28 : vector<16x16xf32>
    %cst_96 = arith.constant dense<0xFF800000> : vector<16xf32>
    %270 = vector.multi_reduction <maximumf>, %269, %cst_96 [1] : vector<16x16xf32> to vector<16xf32>
    %271 = vector.shape_cast %270 : vector<16xf32> to vector<16x1xf32>
    %272 = vector.broadcast %271 : vector<16x1xf32> to vector<16x16xf32>
    %273 = arith.subf %269, %272 : vector<16x16xf32>
    %274 = math.exp %273 : vector<16x16xf32>
    %cst_97 = arith.constant dense<0.000000e+00> : vector<16xf32>
    %275 = vector.multi_reduction <add>, %274, %cst_97 [1] : vector<16x16xf32> to vector<16xf32>
    %276 = vector.shape_cast %275 : vector<16xf32> to vector<16x1xf32>
    %277 = tpu.reciprocal %276 {approx = true} : vector<16x1xf32> -> vector<16x1xf32>
    %278 = vector.broadcast %277 : vector<16x1xf32> to vector<16x16xf32>
    %279 = arith.mulf %274, %278 : vector<16x16xf32>
    %280 = arith.truncf %279 : vector<16x16xf32> to vector<16x16xbf16>
    %cst_98 = arith.constant dense<0.000000e+00> : vector<16x32xf32>
    %281 = tpu.matmul %280, %267, %cst_98 {dimension_numbers = #tpu.dot_dimension_numbers<[1], [0], [0], [1], [0, 0, 1, 1], [], []>} : vector<16x16xbf16>, vector<16x32xbf16>, vector<16x32xf32> -> vector<16x32xf32>
    %282 = vector.extract_strided_slice %221 {offsets = [0, 96], sizes = [16, 32], strides = [1, 1]} : vector<16x384xf32> to vector<16x32xf32>
    %283 = arith.truncf %282 : vector<16x32xf32> to vector<16x32xbf16>
    %284 = vector.extract_strided_slice %221 {offsets = [0, 224], sizes = [16, 32], strides = [1, 1]} : vector<16x384xf32> to vector<16x32xf32>
    %285 = arith.truncf %284 : vector<16x32xf32> to vector<16x32xbf16>
    %286 = vector.extract_strided_slice %221 {offsets = [0, 352], sizes = [16, 32], strides = [1, 1]} : vector<16x384xf32> to vector<16x32xf32>
    %287 = arith.truncf %286 : vector<16x32xf32> to vector<16x32xbf16>
    %cst_99 = arith.constant dense<0.000000e+00> : vector<16x16xf32>
    %288 = tpu.matmul %283, %285, %cst_99 {dimension_numbers = #tpu.dot_dimension_numbers<[1], [1], [0], [0], [0, 0, 1, 0], [], []>} : vector<16x32xbf16>, vector<16x32xbf16>, vector<16x16xf32> -> vector<16x16xf32>
    %289 = arith.addf %288, %28 : vector<16x16xf32>
    %cst_100 = arith.constant dense<0xFF800000> : vector<16xf32>
    %290 = vector.multi_reduction <maximumf>, %289, %cst_100 [1] : vector<16x16xf32> to vector<16xf32>
    %291 = vector.shape_cast %290 : vector<16xf32> to vector<16x1xf32>
    %292 = vector.broadcast %291 : vector<16x1xf32> to vector<16x16xf32>
    %293 = arith.subf %289, %292 : vector<16x16xf32>
    %294 = math.exp %293 : vector<16x16xf32>
    %cst_101 = arith.constant dense<0.000000e+00> : vector<16xf32>
    %295 = vector.multi_reduction <add>, %294, %cst_101 [1] : vector<16x16xf32> to vector<16xf32>
    %296 = vector.shape_cast %295 : vector<16xf32> to vector<16x1xf32>
    %297 = tpu.reciprocal %296 {approx = true} : vector<16x1xf32> -> vector<16x1xf32>
    %298 = vector.broadcast %297 : vector<16x1xf32> to vector<16x16xf32>
    %299 = arith.mulf %294, %298 : vector<16x16xf32>
    %300 = arith.truncf %299 : vector<16x16xf32> to vector<16x16xbf16>
    %cst_102 = arith.constant dense<0.000000e+00> : vector<16x32xf32>
    %301 = tpu.matmul %300, %287, %cst_102 {dimension_numbers = #tpu.dot_dimension_numbers<[1], [0], [0], [1], [0, 0, 1, 1], [], []>} : vector<16x16xbf16>, vector<16x32xbf16>, vector<16x32xf32> -> vector<16x32xf32>
    %302 = tpu.concatenate %241, %261, %281, %301 in 1 : vector<16x32xf32>, vector<16x32xf32>, vector<16x32xf32>, vector<16x32xf32> -> vector<16x128xf32>
    %303 = arith.truncf %302 : vector<16x128xf32> to vector<16x128xbf16>
    %c1_103 = arith.constant 1 : index
    %c0_104 = arith.constant 0 : index
    %c0_105 = arith.constant 0 : index
    %304 = vector.load %arg8[%c1_103, %c0_104, %c0_105] : memref<2x128x128xbf16, #tpu.memory_space<vmem>>, vector<1x128x128xbf16>
    %305 = vector.shape_cast %304 : vector<1x128x128xbf16> to vector<128x128xbf16>
    %cst_106 = arith.constant dense<0.000000e+00> : vector<16x128xf32>
    %306 = tpu.matmul %303, %305, %cst_106 {dimension_numbers = #tpu.dot_dimension_numbers<[1], [0], [0], [1], [0, 0, 1, 1], [], []>} : vector<16x128xbf16>, vector<128x128xbf16>, vector<16x128xf32> -> vector<16x128xf32>
    %c1_107 = arith.constant 1 : index
    %c0_108 = arith.constant 0 : index
    %c0_109 = arith.constant 0 : index
    %307 = vector.load %arg9[%c1_107, %c0_108, %c0_109] : memref<2x1x128xf32, #tpu.memory_space<vmem>>, vector<1x1x128xf32>
    %308 = vector.shape_cast %307 : vector<1x1x128xf32> to vector<1x128xf32>
    %309 = vector.broadcast %308 : vector<1x128xf32> to vector<16x128xf32>
    %310 = arith.addf %306, %309 : vector<16x128xf32>
    %311 = arith.extf %214 : vector<16x128xbf16> to vector<16x128xf32>
    %312 = arith.addf %311, %310 : vector<16x128xf32>
    %c1_110 = arith.constant 1 : index
    %c0_111 = arith.constant 0 : index
    %c0_112 = arith.constant 0 : index
    %313 = vector.load %arg10[%c1_110, %c0_111, %c0_112] : memref<2x1x128xf32, #tpu.memory_space<vmem>>, vector<1x1x128xf32>
    %314 = vector.shape_cast %313 : vector<1x1x128xf32> to vector<1x128xf32>
    %c1_113 = arith.constant 1 : index
    %c0_114 = arith.constant 0 : index
    %c0_115 = arith.constant 0 : index
    %315 = vector.load %arg11[%c1_113, %c0_114, %c0_115] : memref<2x1x128xf32, #tpu.memory_space<vmem>>, vector<1x1x128xf32>
    %316 = vector.shape_cast %315 : vector<1x1x128xf32> to vector<1x128xf32>
    %cst_116 = arith.constant dense<0.000000e+00> : vector<16xf32>
    %317 = vector.multi_reduction <add>, %312, %cst_116 [1] : vector<16x128xf32> to vector<16xf32>
    %318 = vector.shape_cast %317 : vector<16xf32> to vector<16x1xf32>
    %cst_117 = arith.constant 1.280000e+02 : f32
    %319 = vector.broadcast %cst_117 : f32 to vector<16x1xf32>
    %320 = arith.divf %318, %319 : vector<16x1xf32>
    %321 = vector.broadcast %320 : vector<16x1xf32> to vector<16x128xf32>
    %322 = arith.subf %312, %321 : vector<16x128xf32>
    %323 = vector.broadcast %320 : vector<16x1xf32> to vector<16x128xf32>
    %324 = arith.subf %312, %323 : vector<16x128xf32>
    %325 = arith.mulf %322, %324 : vector<16x128xf32>
    %cst_118 = arith.constant dense<0.000000e+00> : vector<16xf32>
    %326 = vector.multi_reduction <add>, %325, %cst_118 [1] : vector<16x128xf32> to vector<16xf32>
    %327 = vector.shape_cast %326 : vector<16xf32> to vector<16x1xf32>
    %cst_119 = arith.constant 1.280000e+02 : f32
    %328 = vector.broadcast %cst_119 : f32 to vector<16x1xf32>
    %329 = arith.divf %327, %328 : vector<16x1xf32>
    %330 = vector.broadcast %320 : vector<16x1xf32> to vector<16x128xf32>
    %331 = arith.subf %312, %330 : vector<16x128xf32>
    %cst_120 = arith.constant 9.99999996E-13 : f32
    %332 = vector.broadcast %cst_120 : f32 to vector<16x1xf32>
    %333 = arith.addf %329, %332 : vector<16x1xf32>
    %334 = math.rsqrt %333 : vector<16x1xf32>
    %335 = vector.broadcast %334 : vector<16x1xf32> to vector<16x128xf32>
    %336 = arith.mulf %331, %335 : vector<16x128xf32>
    %337 = vector.broadcast %314 : vector<1x128xf32> to vector<16x128xf32>
    %338 = arith.mulf %336, %337 : vector<16x128xf32>
    %339 = vector.broadcast %316 : vector<1x128xf32> to vector<16x128xf32>
    %340 = arith.addf %338, %339 : vector<16x128xf32>
    %341 = arith.truncf %340 : vector<16x128xf32> to vector<16x128xbf16>
    %c1_121 = arith.constant 1 : index
    %c0_122 = arith.constant 0 : index
    %c0_123 = arith.constant 0 : index
    %342 = vector.load %arg12[%c1_121, %c0_122, %c0_123] : memref<2x128x256xbf16, #tpu.memory_space<vmem>>, vector<1x128x256xbf16>
    %343 = vector.shape_cast %342 : vector<1x128x256xbf16> to vector<128x256xbf16>
    %cst_124 = arith.constant dense<0.000000e+00> : vector<16x256xf32>
    %344 = tpu.matmul %341, %343, %cst_124 {dimension_numbers = #tpu.dot_dimension_numbers<[1], [0], [0], [1], [0, 0, 1, 1], [], []>} : vector<16x128xbf16>, vector<128x256xbf16>, vector<16x256xf32> -> vector<16x256xf32>
    %c1_125 = arith.constant 1 : index
    %c0_126 = arith.constant 0 : index
    %c0_127 = arith.constant 0 : index
    %345 = vector.load %arg13[%c1_125, %c0_126, %c0_127] : memref<2x1x256xf32, #tpu.memory_space<vmem>>, vector<1x1x256xf32>
    %346 = vector.shape_cast %345 : vector<1x1x256xf32> to vector<1x256xf32>
    %347 = vector.broadcast %346 : vector<1x256xf32> to vector<16x256xf32>
    %348 = arith.addf %344, %347 : vector<16x256xf32>
    %349 = arith.mulf %348, %348 : vector<16x256xf32>
    %350 = arith.mulf %348, %349 : vector<16x256xf32>
    %cst_128 = arith.constant 4.471500e-02 : f32
    %351 = vector.broadcast %cst_128 : f32 to vector<16x256xf32>
    %352 = arith.mulf %351, %350 : vector<16x256xf32>
    %353 = arith.addf %348, %352 : vector<16x256xf32>
    %cst_129 = arith.constant 0.797884583 : f32
    %354 = vector.broadcast %cst_129 : f32 to vector<16x256xf32>
    %355 = arith.mulf %354, %353 : vector<16x256xf32>
    %356 = math.tanh %355 : vector<16x256xf32>
    %cst_130 = arith.constant 1.000000e+00 : f32
    %357 = vector.broadcast %cst_130 : f32 to vector<16x256xf32>
    %358 = arith.addf %357, %356 : vector<16x256xf32>
    %cst_131 = arith.constant 5.000000e-01 : f32
    %359 = vector.broadcast %cst_131 : f32 to vector<16x256xf32>
    %360 = arith.mulf %359, %358 : vector<16x256xf32>
    %361 = arith.mulf %348, %360 : vector<16x256xf32>
    %362 = arith.truncf %361 : vector<16x256xf32> to vector<16x256xbf16>
    %c1_132 = arith.constant 1 : index
    %c0_133 = arith.constant 0 : index
    %c0_134 = arith.constant 0 : index
    %363 = vector.load %arg14[%c1_132, %c0_133, %c0_134] : memref<2x256x128xbf16, #tpu.memory_space<vmem>>, vector<1x256x128xbf16>
    %364 = vector.shape_cast %363 : vector<1x256x128xbf16> to vector<256x128xbf16>
    %cst_135 = arith.constant dense<0.000000e+00> : vector<16x128xf32>
    %365 = tpu.matmul %362, %364, %cst_135 {dimension_numbers = #tpu.dot_dimension_numbers<[1], [0], [0], [1], [0, 0, 1, 1], [], []>} : vector<16x256xbf16>, vector<256x128xbf16>, vector<16x128xf32> -> vector<16x128xf32>
    %c1_136 = arith.constant 1 : index
    %c0_137 = arith.constant 0 : index
    %c0_138 = arith.constant 0 : index
    %366 = vector.load %arg15[%c1_136, %c0_137, %c0_138] : memref<2x1x128xf32, #tpu.memory_space<vmem>>, vector<1x1x128xf32>
    %367 = vector.shape_cast %366 : vector<1x1x128xf32> to vector<1x128xf32>
    %368 = vector.broadcast %367 : vector<1x128xf32> to vector<16x128xf32>
    %369 = arith.addf %365, %368 : vector<16x128xf32>
    %370 = arith.extf %341 : vector<16x128xbf16> to vector<16x128xf32>
    %371 = arith.addf %370, %369 : vector<16x128xf32>
    %c1_139 = arith.constant 1 : index
    %c0_140 = arith.constant 0 : index
    %c0_141 = arith.constant 0 : index
    %372 = vector.load %arg16[%c1_139, %c0_140, %c0_141] : memref<2x1x128xf32, #tpu.memory_space<vmem>>, vector<1x1x128xf32>
    %373 = vector.shape_cast %372 : vector<1x1x128xf32> to vector<1x128xf32>
    %c1_142 = arith.constant 1 : index
    %c0_143 = arith.constant 0 : index
    %c0_144 = arith.constant 0 : index
    %374 = vector.load %arg17[%c1_142, %c0_143, %c0_144] : memref<2x1x128xf32, #tpu.memory_space<vmem>>, vector<1x1x128xf32>
    %375 = vector.shape_cast %374 : vector<1x1x128xf32> to vector<1x128xf32>
    %cst_145 = arith.constant dense<0.000000e+00> : vector<16xf32>
    %376 = vector.multi_reduction <add>, %371, %cst_145 [1] : vector<16x128xf32> to vector<16xf32>
    %377 = vector.shape_cast %376 : vector<16xf32> to vector<16x1xf32>
    %cst_146 = arith.constant 1.280000e+02 : f32
    %378 = vector.broadcast %cst_146 : f32 to vector<16x1xf32>
    %379 = arith.divf %377, %378 : vector<16x1xf32>
    %380 = vector.broadcast %379 : vector<16x1xf32> to vector<16x128xf32>
    %381 = arith.subf %371, %380 : vector<16x128xf32>
    %382 = vector.broadcast %379 : vector<16x1xf32> to vector<16x128xf32>
    %383 = arith.subf %371, %382 : vector<16x128xf32>
    %384 = arith.mulf %381, %383 : vector<16x128xf32>
    %cst_147 = arith.constant dense<0.000000e+00> : vector<16xf32>
    %385 = vector.multi_reduction <add>, %384, %cst_147 [1] : vector<16x128xf32> to vector<16xf32>
    %386 = vector.shape_cast %385 : vector<16xf32> to vector<16x1xf32>
    %cst_148 = arith.constant 1.280000e+02 : f32
    %387 = vector.broadcast %cst_148 : f32 to vector<16x1xf32>
    %388 = arith.divf %386, %387 : vector<16x1xf32>
    %389 = vector.broadcast %379 : vector<16x1xf32> to vector<16x128xf32>
    %390 = arith.subf %371, %389 : vector<16x128xf32>
    %cst_149 = arith.constant 9.99999996E-13 : f32
    %391 = vector.broadcast %cst_149 : f32 to vector<16x1xf32>
    %392 = arith.addf %388, %391 : vector<16x1xf32>
    %393 = math.rsqrt %392 : vector<16x1xf32>
    %394 = vector.broadcast %393 : vector<16x1xf32> to vector<16x128xf32>
    %395 = arith.mulf %390, %394 : vector<16x128xf32>
    %396 = vector.broadcast %373 : vector<1x128xf32> to vector<16x128xf32>
    %397 = arith.mulf %395, %396 : vector<16x128xf32>
    %398 = vector.broadcast %375 : vector<1x128xf32> to vector<16x128xf32>
    %399 = arith.addf %397, %398 : vector<16x128xf32>
    %400 = arith.truncf %399 : vector<16x128xf32> to vector<16x128xbf16>
    %c0_150 = arith.constant 0 : index
    %c0_151 = arith.constant 0 : index
    %401 = vector.load %arg3[%c0_150, %c0_151] : memref<2x16xf32, #tpu.memory_space<vmem>>, vector<2x16xf32>
    %402 = arith.truncf %401 : vector<2x16xf32> to vector<2x16xbf16>
    %cst_152 = arith.constant dense<0.000000e+00> : vector<2x128xf32>
    %403 = tpu.matmul %402, %400, %cst_152 {dimension_numbers = #tpu.dot_dimension_numbers<[1], [0], [0], [1], [0, 0, 1, 1], [], []>} : vector<2x16xbf16>, vector<16x128xbf16>, vector<2x128xf32> -> vector<2x128xf32>
    %cst_153 = arith.constant dense<0.000000e+00> : vector<2xf32>
    %404 = vector.multi_reduction <add>, %401, %cst_153 [1] : vector<2x16xf32> to vector<2xf32>
    %405 = vector.shape_cast %404 : vector<2xf32> to vector<2x1xf32>
    %cst_154 = arith.constant 9.99999971E-10 : f32
    %406 = vector.broadcast %cst_154 : f32 to vector<2x1xf32>
    %407 = arith.maximumf %405, %406 : vector<2x1xf32>
    %408 = vector.broadcast %407 : vector<2x1xf32> to vector<2x128xf32>
    %409 = arith.divf %403, %408 : vector<2x128xf32>
    %c0_155 = arith.constant 0 : index
    %c0_156 = arith.constant 0 : index
    %410 = vector.load %arg18[%c0_155, %c0_156] : memref<2x128xf32, #tpu.memory_space<vmem>>, vector<2x128xf32>
    tpu.vector_store %arg18[%c0_155, %c0_156], %409 {strides = array<i32>} : memref<2x128xf32, #tpu.memory_space<vmem>>, vector<2x128xf32>,
    return
  }
  func.func @transform_0(%arg0: i32) -> (i32, i32) {
    %c0_i32 = arith.constant 0 : i32
    %c0_i32_0 = arith.constant 0 : i32
    %c0_i32_1 = arith.constant 0 : i32
    return %c0_i32, %c0_i32_0 : i32, i32
  }
  func.func @transform_1(%arg0: i32) -> (i32, i32) {
    %c0_i32 = arith.constant 0 : i32
    %c0_i32_0 = arith.constant 0 : i32
    %c0_i32_1 = arith.constant 0 : i32
    return %c0_i32, %c0_i32_0 : i32, i32
  }
  func.func @transform_2(%arg0: i32) -> (i32, i32) {
    %c0_i32 = arith.constant 0 : i32
    %c0_i32_0 = arith.constant 0 : i32
    %c0_i32_1 = arith.constant 0 : i32
    return %c0_i32, %c0_i32_0 : i32, i32
  }
  func.func @transform_3(%arg0: i32) -> (i32, i32) {
    %c0_i32 = arith.constant 0 : i32
    %c0_i32_0 = arith.constant 0 : i32
    %c0_i32_1 = arith.constant 0 : i32
    return %c0_i32, %c0_i32_0 : i32, i32
  }
  func.func @transform_4(%arg0: i32) -> (i32, i32) {
    %c0_i32 = arith.constant 0 : i32
    %c0_i32_0 = arith.constant 0 : i32
    %c0_i32_1 = arith.constant 0 : i32
    return %c0_i32, %c0_i32_0 : i32, i32
  }
  func.func @transform_5(%arg0: i32) -> (i32, i32, i32) {
    %c0_i32 = arith.constant 0 : i32
    %c0_i32_0 = arith.constant 0 : i32
    %c0_i32_1 = arith.constant 0 : i32
    %c0_i32_2 = arith.constant 0 : i32
    return %c0_i32, %c0_i32_0, %c0_i32_1 : i32, i32, i32
  }
  func.func @transform_6(%arg0: i32) -> (i32, i32, i32) {
    %c0_i32 = arith.constant 0 : i32
    %c0_i32_0 = arith.constant 0 : i32
    %c0_i32_1 = arith.constant 0 : i32
    %c0_i32_2 = arith.constant 0 : i32
    return %c0_i32, %c0_i32_0, %c0_i32_1 : i32, i32, i32
  }
  func.func @transform_7(%arg0: i32) -> (i32, i32, i32) {
    %c0_i32 = arith.constant 0 : i32
    %c0_i32_0 = arith.constant 0 : i32
    %c0_i32_1 = arith.constant 0 : i32
    %c0_i32_2 = arith.constant 0 : i32
    return %c0_i32, %c0_i32_0, %c0_i32_1 : i32, i32, i32
  }
  func.func @transform_8(%arg0: i32) -> (i32, i32, i32) {
    %c0_i32 = arith.constant 0 : i32
    %c0_i32_0 = arith.constant 0 : i32
    %c0_i32_1 = arith.constant 0 : i32
    %c0_i32_2 = arith.constant 0 : i32
    return %c0_i32, %c0_i32_0, %c0_i32_1 : i32, i32, i32
  }
  func.func @transform_9(%arg0: i32) -> (i32, i32, i32) {
    %c0_i32 = arith.constant 0 : i32
    %c0_i32_0 = arith.constant 0 : i32
    %c0_i32_1 = arith.constant 0 : i32
    %c0_i32_2 = arith.constant 0 : i32
    return %c0_i32, %c0_i32_0, %c0_i32_1 : i32, i32, i32
  }
  func.func @transform_10(%arg0: i32) -> (i32, i32, i32) {
    %c0_i32 = arith.constant 0 : i32
    %c0_i32_0 = arith.constant 0 : i32
    %c0_i32_1 = arith.constant 0 : i32
    %c0_i32_2 = arith.constant 0 : i32
    return %c0_i32, %c0_i32_0, %c0_i32_1 : i32, i32, i32
  }
  func.func @transform_11(%arg0: i32) -> (i32, i32, i32) {
    %c0_i32 = arith.constant 0 : i32
    %c0_i32_0 = arith.constant 0 : i32
    %c0_i32_1 = arith.constant 0 : i32
    %c0_i32_2 = arith.constant 0 : i32
    return %c0_i32, %c0_i32_0, %c0_i32_1 : i32, i32, i32
  }
  func.func @transform_12(%arg0: i32) -> (i32, i32, i32) {
    %c0_i32 = arith.constant 0 : i32
    %c0_i32_0 = arith.constant 0 : i32
    %c0_i32_1 = arith.constant 0 : i32
    %c0_i32_2 = arith.constant 0 : i32
    return %c0_i32, %c0_i32_0, %c0_i32_1 : i32, i32, i32
  }
  func.func @transform_13(%arg0: i32) -> (i32, i32, i32) {
    %c0_i32 = arith.constant 0 : i32
    %c0_i32_0 = arith.constant 0 : i32
    %c0_i32_1 = arith.constant 0 : i32
    %c0_i32_2 = arith.constant 0 : i32
    return %c0_i32, %c0_i32_0, %c0_i32_1 : i32, i32, i32
  }
  func.func @transform_14(%arg0: i32) -> (i32, i32, i32) {
    %c0_i32 = arith.constant 0 : i32
    %c0_i32_0 = arith.constant 0 : i32
    %c0_i32_1 = arith.constant 0 : i32
    %c0_i32_2 = arith.constant 0 : i32
    return %c0_i32, %c0_i32_0, %c0_i32_1 : i32, i32, i32
  }
  func.func @transform_15(%arg0: i32) -> (i32, i32, i32) {
    %c0_i32 = arith.constant 0 : i32
    %c0_i32_0 = arith.constant 0 : i32
    %c0_i32_1 = arith.constant 0 : i32
    %c0_i32_2 = arith.constant 0 : i32
    return %c0_i32, %c0_i32_0, %c0_i32_1 : i32, i32, i32
  }
  func.func @transform_16(%arg0: i32) -> (i32, i32, i32) {
    %c0_i32 = arith.constant 0 : i32
    %c0_i32_0 = arith.constant 0 : i32
    %c0_i32_1 = arith.constant 0 : i32
    %c0_i32_2 = arith.constant 0 : i32
    return %c0_i32, %c0_i32_0, %c0_i32_1 : i32, i32, i32
  }
  func.func @transform_17(%arg0: i32) -> (i32, i32) {
    %c0_i32 = arith.constant 0 : i32
    %c0_i32_0 = arith.constant 0 : i32
    %c0_i32_1 = arith.constant 0 : i32
    return %c0_i32, %c0_i32_0 : i32, i32
  }
}

</mosaic_0001>

<bundles_post_ra>
// kernel: sentence_bert_encode.1
= control target key start
LH: loop header
LB: loop body
LE: loop exit
PB: predicated region body
PF: predicated region fallthrough
CT: control target
= control target key end

     0   :  { %s4397_s0 = inlined_call_operand.vmem [shape: f32[16,128], index: 0, kind: input, shape index: {}]   ;;  %s4398_s1 = inlined_call_operand.vmem [shape: f32[16,16], index: 1, kind: input, shape index: {}]   ;;  %s4399_s2 = inlined_call_operand.vmem [shape: f32[2,16], index: 2, kind: input, shape index: {}]   ;;  %s4400_s3 = inlined_call_operand.vmem [shape: f32[1,128], index: 3, kind: input, shape index: {}]   ;;  %s4401_s4 = inlined_call_operand.vmem [shape: f32[1,128], index: 4, kind: input, shape index: {}]   ;;  %s4402_s5 = inlined_call_operand.hbm [shape: bf16[2,128,384], index: 5, kind: input, shape index: {}]   ;;  %s4403_s6 = inlined_call_operand.vmem [shape: f32[2,1,384], index: 6, kind: input, shape index: {}]   ;;  %s4404_s7 = inlined_call_operand.hbm [shape: bf16[2,128,128], index: 7, kind: input, shape index: {}]   ;;  %s4405_s8 = inlined_call_operand.vmem [shape: f32[2,1,128], index: 8, kind: input, shape index: {}]   ;;  %s4406_s9 = inlined_call_operand.vmem [shape: f32[2,1,128], index: 9, kind: input, shape index: {}]   ;;  %s4407_s10 = inlined_call_operand.vmem [shape: f32[2,1,128], index: 10, kind: input, shape index: {}]   ;;  %s4408_s11 = inlined_call_operand.vmem [shape: bf16[2,128,256], index: 11, kind: input, shape index: {}]   ;;  %s4409_s12 = inlined_call_operand.vmem [shape: f32[2,1,256], index: 12, kind: input, shape index: {}]   ;;  %s4410_s13 = inlined_call_operand.hbm [shape: bf16[2,256,128], index: 13, kind: input, shape index: {}]   ;;  %s4411_s14 = inlined_call_operand.vmem [shape: f32[2,1,128], index: 14, kind: input, shape index: {}]   ;;  %s4412_s15 = inlined_call_operand.vmem [shape: f32[2,1,128], index: 15, kind: input, shape index: {}]   ;;  %s4413_s16 = inlined_call_operand.vmem [shape: f32[2,1,128], index: 16, kind: input, shape index: {}]   ;;  %s4414_s17 = inlined_call_operand.hbm [shape: f32[2,128], index: 17, kind: output, shape index: {}]  }
   0x1   :  { %4419 = sst [smem:[#allocation12_spill]] %s4397_s0 }
   0x2   :  { %4420 = sst [smem:[#allocation13_spill]] %s4398_s1 }
   0x3   :  { %22 = vsyncpa [#allocation3], 0 }
   0x4   :  { %23 = vsyncpa [#allocation6], 0 }
   0x5   :  { %24 = vsyncpa [#allocation4], 0  ;;  %s3794_s24 = smov [#allocation5]   ;;  %s3700_s28 = scalar_lea.hbm %s4404_s7, 2048 }
   0x6   :  { %s54_s25 = sshll.u32 %s3794_s24, 4  ;;  %p3701_p0 = scmp.ne.s32.totalorder %s4404_s7, %s3700_s28  ;;  %s55_s25 = int_to_ptr.vmem [resolvable:$true] %s54_s25 }
   0x7   :  { %p3704_p1 = scmp.lt.u32.totalorder %s3700_s28, %s4404_s7 }
   0x9   :  { %p3706_p2 = pnand %p3704_p1, %p3701_p0 }
   0xb   :  { %3709 = shalt.err (!%p3706_p2)
}
   0xc   :  { %s3710_s19 = scalar_lea.vmem %s55_s25, 2048  ;;  %p3715_p4 = scmp.lt.s32.totalorder %s55_s25, %s55_s25 }
   0xd   :  { %p3711_p3 = scmp.ne.s32.totalorder %s55_s25, %s3710_s19  ;;  %p3716_p5 = scmp.lt.s32.totalorder %s3710_s19, %s3710_s19 }
   0xf   :  { %p3717_p6 = por %p3716_p5, %p3715_p4 }
  0x11   :  { %p3718_p7 = pnand %p3717_p6, %p3711_p3 }
  0x13   :  { %3721 = shalt.err (!%p3718_p7)
}
  0x14   :  { %s4417_s1 = smov 64   ;;  %s3796_s20 = smov 4  }
  0x15   :  { %60 = dma.hbm_to_vmem [thread:$0]  %s4404_s7, 2048, %s55_s25, [#allocation6], %s4417_s1, %s4417_s1, %s3796_s20  }
  0x16   :  { %s3797_s23 = smov [#allocation2]   ;;  %s3722_s28 = scalar_lea.hbm %s4402_s5, 6144 }
  0x17   :  { %s40_s24 = sshll.u32 %s3797_s23, 4  ;;  %p3723_p8 = scmp.ne.s32.totalorder %s4402_s5, %s3722_s28  ;;  %s41_s24 = int_to_ptr.vmem [resolvable:$true] %s40_s24 }
  0x18   :  { %p3726_p9 = scmp.lt.u32.totalorder %s3722_s28, %s4402_s5 }
  0x1a   :  { %p3728_p10 = pnand %p3726_p9, %p3723_p8 }
  0x1c   :  { %3731 = shalt.err (!%p3728_p10)
}
  0x1d   :  { %s3732_s19 = scalar_lea.vmem %s41_s24, 6144  ;;  %p3737_p12 = scmp.lt.s32.totalorder %s41_s24, %s41_s24 }
  0x1e   :  { %p3733_p11 = scmp.ne.s32.totalorder %s41_s24, %s3732_s19  ;;  %p3738_p13 = scmp.lt.s32.totalorder %s3732_s19, %s3732_s19 }
  0x20   :  { %p3739_p0 = por %p3738_p13, %p3737_p12 }
  0x22   :  { %p3740_p1 = pnand %p3739_p0, %p3733_p11 }
  0x24   :  { %3743 = shalt.err (!%p3740_p1)
}
  0x25   :  { %s3798_s7 = smov 192   ;;  %s3799_s25 = smov 12  }
  0x26   :  { %46 = dma.hbm_to_vmem [thread:$0]  %s4402_s5, 6144, %s41_s24, [#allocation3], %s3798_s7, %s3798_s7, %s3799_s25  }
  0x27   :  { %s3800_s23 = smov [#allocation7]   ;;  %s3744_s29 = scalar_lea.hbm %s4410_s13, 4096 }
  0x28   :  { %s76_s26 = sshll.u32 %s3800_s23, 4  ;;  %p3745_p2 = scmp.ne.s32.totalorder %s4410_s13, %s3744_s29  ;;  %s77_s26 = int_to_ptr.vmem [resolvable:$true] %s76_s26 }
  0x29   :  { %p3748_p3 = scmp.lt.u32.totalorder %s3744_s29, %s4410_s13 }
  0x2b   :  { %p3750_p4 = pnand %p3748_p3, %p3745_p2 }
  0x2d   :  { %3753 = shalt.err (!%p3750_p4)
}
  0x2e   :  { %s3754_s1 = scalar_lea.vmem %s77_s26, 4096  ;;  %p3759_p6 = scmp.lt.s32.totalorder %s77_s26, %s77_s26 }
  0x2f   :  { %p3755_p5 = scmp.ne.s32.totalorder %s77_s26, %s3754_s1  ;;  %p3760_p7 = scmp.lt.s32.totalorder %s3754_s1, %s3754_s1 }
  0x31   :  { %p3761_p8 = por %p3760_p7, %p3759_p6 }
  0x33   :  { %p3762_p9 = pnand %p3761_p8, %p3755_p5 }
  0x35   :  { %3765 = shalt.err (!%p3762_p9)
}
  0x36   :  { %s4421_s5 = smov 64  }
  0x37   :  { %82 = dma.hbm_to_vmem [thread:$0]  %s4410_s13, 4096, %s77_s26, [#allocation6], %s4421_s5, %s4421_s5, %s3796_s20  }
  0x38   :  { %3788 = dma.done.wait [#allocation3], 6144  }
  0x39   :  { %3789 = vsyncadd [#allocation3], 4294961152 }
  0x3a   :  { %3790 = dma.done.wait [#allocation6], 6144  }
  0x3b   :  { %3791 = vsyncadd [#allocation6], 4294961152  ;;  %s4422_s22 = sld [smem:[#allocation12_spill]]  ;;  %v3436_v2 = vld [vmem:[#allocation2 + $0x4] ss:$12 sps:$4 sm:$0xff]   ;;  %v3801_v4 = vmov 0.0   ;;  %v179_v53 = vlaneseq }
  0x3c   :  { %v3438_v3 = vld [vmem:[#allocation2] ss:$12 sps:$4 sm:$0xff]   ;;  %3211 = vmatprep.subr.bf16.mxu1 %v3801_v4  ;;  %v3439_v5 = vld [vmem:[#allocation2 + $0x8] ss:$12 sps:$4 sm:$0xff]   ;;  %322 = vmatprep.subr.bf16.mxu0 %v3436_v2  ;;  %v3442_v15 = vld [vmem:[#allocation2 + $0x18] ss:$12 sps:$4 sm:$0xff]  }
  0x3d   :  { %v3440_v6 = vld [vmem:[#allocation2 + $0x1c] ss:$12 sps:$4 sm:$0xff]   ;;  %323 = vmatpush1.bf16.msra.mxu0 %v3438_v3  ;;  %3212 = vmatpush3.bf16.msra.mxu1 %v3439_v5  ;;  %v3443_v16 = vld [vmem:[#allocation2 + $0x20] ss:$12 sps:$4 sm:$0xff]   ;;  %v3447_v19 = vld [vmem:[#allocation2 + $0x38] ss:$12 sps:$4 sm:$0xff]  }
  0x3e   :  { %324 = vmatprep.subr.bf16.mxu0 %v3440_v6  ;;  %3213 = vmatprep.subr.bf16.mxu1 %v3801_v4  ;;  %v3444_v17 = vld [vmem:[#allocation2 + $0x34] ss:$12 sps:$4 sm:$0xff]   ;;  %v3446_v18 = vld [vmem:[#allocation2 + $0x30] ss:$12 sps:$4 sm:$0xff]   ;;  %v3448_v20 = vld [vmem:[#allocation2 + $0x4c] ss:$12 sps:$4 sm:$0xff]  }
  0x3f   :  { %v3450_v21 = vld [vmem:[#allocation2 + $0x48] ss:$12 sps:$4 sm:$0xff]   ;;  %v3451_v22 = vld [vmem:[#allocation2 + $0x50] ss:$12 sps:$4 sm:$0xff]   ;;  %v3454_v24 = vld [vmem:[#allocation2 + $0x60] ss:$12 sps:$4 sm:$0xff]  }
  0x40   :  { %v3452_v23 = vld [vmem:[#allocation2 + $0x64] ss:$12 sps:$4 sm:$0xff]   ;;  %v3455_v25 = vld [vmem:[#allocation2 + $0x68] ss:$12 sps:$4 sm:$0xff]   ;;  %v3459_v28 = vld [vmem:[#allocation2 + $0x80] ss:$12 sps:$4 sm:$0xff]  }
  0x41   :  { %v99_v0 = vld [vmem:[%s4422_s22] sm:$0xff]  ;;  %v100_v1 = vld [vmem:[%s4422_s22 + $0x8] sm:$0xff]  ;;  %325 = vmatpush1.bf16.msra.mxu0 %v3442_v15  ;;  %3214 = vmatpush3.bf16.msra.mxu1 %v3443_v16  ;;  %v3466_v33 = vld [vmem:[#allocation2 + $0xa8] ss:$12 sps:$4 sm:$0xff]   ;;  %v3802_v35 = vmov 0   ;;  %vm3803_vm0 = vmmov 0  }
  0x42   :  { %103 = vadd.xlane.f32.xlu0 %v99_v0  ;;  %3215 = vmatprep.subr.bf16.mxu1 %v3801_v4  ;;  %v3456_v26 = vld [vmem:[#allocation2 + $0x7c] ss:$12 sps:$4 sm:$0xff]   ;;  %v3458_v27 = vld [vmem:[#allocation2 + $0x78] ss:$12 sps:$4 sm:$0xff]   ;;  %v3460_v29 = vld [vmem:[#allocation2 + $0x94] ss:$12 sps:$4 sm:$0xff]  }
  0x43   :  { %326 = vmatprep.subr.bf16.mxu0 %v3444_v17  ;;  %v3462_v30 = vld [vmem:[#allocation2 + $0x90] ss:$12 sps:$4 sm:$0xff]   ;;  %v3463_v31 = vld [vmem:[#allocation2 + $0x98] ss:$12 sps:$4 sm:$0xff]   ;;  %354 = vmatprep.mubr.bf16.mxu0 %v3802_v35  ;;  %v3982_v54 = vshrl.u32 %v179_v53, 7  ;;  %vm409_vm1 = vcmask 261120  }
  0x44   :  { %v3464_v32 = vld [vmem:[#allocation2 + $0xac] ss:$12 sps:$4 sm:$0xff]   ;;  %v3467_v34 = vld [vmem:[#allocation2 + $0xb0] ss:$12 sps:$4 sm:$0xff]   ;;  %3227 = vmatprep.mubr.msk.bf16.mxu1 %vm3803_vm0, %v3801_v4  ;;  %s3804_s28 = smov 96   ;;  %s3805_s29 = smov 32  }
  0x45   :  { %327 = vmatpush1.bf16.msra.mxu0 %v3446_v18  ;;  %3216 = vmatpush3.bf16.msra.mxu1 %v3447_v19  ;;  %v2914_v44 = vld [vmem:[%s4400_s3] ss:$0 sm:$0xff]  ;;  %v3985_v55 = vsub.s32 0, %v3982_v54  ;;  %v189_v56 = vsub.s32 2, %v3982_v54  ;;  %v3992_v58 = vsub.s32 1, %v3982_v54  ;;  %s4423_s18 = sld [smem:[#allocation13_spill]] }
  0x46   :  { %105 = vadd.xlane.f32.xlu0 %v100_v1  ;;  %3217 = vmatprep.subr.bf16.mxu1 %v3801_v4  ;;  %v2915_v48 = vld [vmem:[%s4401_s4] ss:$0 sm:$0xff]  ;;  %vm457_vm2 = vcmask 130048   ;;  %vm917_vm3 = vcmask 523264   ;;  %vm920_vm4 = vcmask 785408   ;;  %vm2890_vm5 = vcmask 123904  }
  0x47   :  { %328 = vmatprep.subr.bf16.mxu0 %v3448_v20  ;;  %v177_v57 = vld [vmem:[%s4403_s6] sm:$0x7] }
  0x48   :  { %v182_v59 = vrot.slane %v177_v57, %v3985_v55  ;;  %v190_v60 = vrot.slane %v177_v57, %v189_v56  ;;  %v186_v63 = vrot.slane %v177_v57, %v3992_v58 }
  0x49   :  { %329 = vmatpush1.bf16.msra.mxu0 %v3450_v21  ;;  %3218 = vmatpush3.bf16.msra.mxu1 %v3451_v22 }
  0x4a   :  { %3219 = vmatprep.subr.bf16.mxu1 %v3801_v4  ;;  %330 = vmatprep.subr.bf16.mxu0 %v3452_v23 }
  0x4d   :  { %331 = vmatpush1.bf16.msra.mxu0 %v3454_v24  ;;  %3220 = vmatpush3.bf16.msra.mxu1 %v3455_v25 }
  0x4e   :  { %3221 = vmatprep.subr.bf16.mxu1 %v3801_v4  ;;  %332 = vmatprep.subr.bf16.mxu0 %v3456_v26  ;;  %v143_v26 = vld [vmem:[%s4423_s18] sm:$0xff] }
  0x51   :  { %333 = vmatpush1.bf16.msra.mxu0 %v3458_v27  ;;  %3222 = vmatpush3.bf16.msra.mxu1 %v3459_v28  ;;  %v144_v28 = vld [vmem:[%s4423_s18 + $0x8] sm:$0xff] }
  0x52   :  { %3223 = vmatprep.subr.bf16.mxu1 %v3801_v4  ;;  %334 = vmatprep.subr.bf16.mxu0 %v3460_v29 }
  0x55   :  { %335 = vmatpush1.bf16.msra.mxu0 %v3462_v30  ;;  %3224 = vmatpush3.bf16.msra.mxu1 %v3463_v31 }
  0x56   :  { %336 = vmatprep.subr.bf16.mxu0 %v3464_v32  ;;  %3225 = vmatprep.subr.bf16.mxu1 %v3801_v4 }
  0x59   :  { %337 = vmatpush1.bf16.msra.mxu0 %v3466_v33  ;;  %3226 = vmatpush3.bf16.msra.mxu1 %v3467_v34 }
  0x5a   :  { %3231 = vmatprep.subr.bf16.mxu1 %v3801_v4  ;;  %3243 = vmatprep.subr.bf16.mxu0 %v3801_v4 }
  0xcf   :  { %v104_v7 = vpop.xlane.xlu0 %103 }
  0xd0   :  { %v108_v8 = vmul.f32 0.0078125, %v104_v7 }
  0xd2   :  { %v3947_v9 = vsub.f32 %v99_v0, %v108_v8 }
  0xd3   :  { %v106_v10 = vpop.xlane.xlu0 %105 }
  0xd4   :  { %v109_v11 = vmul.f32 0.0078125, %v106_v10  ;;  %v112_v12 = vmul.f32 %v3947_v9, %v3947_v9 }
  0xd6   :  { %v3951_v13 = vsub.f32 %v100_v1, %v109_v11  ;;  %114 = vadd.xlane.f32.xlu1 %v112_v12 }
  0xd8   :  { %v113_v14 = vmul.f32 %v3951_v13, %v3951_v13 }
  0xda   :  { %116 = vadd.xlane.f32.xlu1 %v113_v14 }
 0x163   :  { %v115_v36 = vpop.xlane.xlu1 %114 }
 0x164   :  { %v118_v37 = vmul.f32 0.0078125, %v115_v36 }
 0x166   :  { %v120_v38 = vadd.f32 1e-12, %v118_v37 }
 0x167   :  { %v117_v39 = vpop.xlane.xlu1 %116 }
 0x168   :  { %3596 = vrsqrt.f32 %v120_v38  ;;  %v119_v40 = vmul.f32 0.0078125, %v117_v39 }
 0x16a   :  { %v121_v41 = vadd.f32 1e-12, %v119_v40 }
 0x16c   :  { %3598 = vrsqrt.f32 %v121_v41 }
 0x172   :  { %v3597_v42 = vpop.eup %3596 }
 0x173   :  { %v124_v43 = vmul.f32 %v3597_v42, %v3947_v9 }
 0x175   :  { %v132_v47 = vmul.f32 %v2914_v44, %v124_v43 }
 0x176   :  { %v3599_v45 = vpop.eup %3598 }
 0x177   :  { %v125_v46 = vmul.f32 %v3599_v45, %v3951_v13  ;;  %v140_v50 = vadd.f32 %v2915_v48, %v132_v47 }
 0x179   :  { %v133_v49 = vmul.f32 %v2914_v44, %v125_v46 }
 0x17b   :  { %v141_v51 = vadd.f32 %v2915_v48, %v133_v49 }
 0x17d   :  { %v3974_v52 = vpack.c.bf16 %v141_v51, %v140_v50 }
 0x17f   :  { %355 = vmatmul.mubr.bf16.vlgmr.msra.gmra.mrb[0].mxu0 %v3974_v52  ;;  %3228 = vmatmul.mubr.bf16.vlgmr.msra.gmra.mrb[0].mxu1 %v3974_v52 }
 0x180   :  { %3233 = vmatprep.mubr.msk.bf16.mxu1 %vm3803_vm0, %v3801_v4  ;;  %3245 = vmatprep.mubr.msk.bf16.mxu0 %vm3803_vm0, %v3801_v4 }
 0x252   :  { %v356_v61 = vpop.f32.mrb[0].mxu0  ;;  %v399_v62 = vpop.f32.mrb[0].mxu1 }
 0x253   :  { %v358_v0 = vpop.f32.mrb[1].mxu0  ;;  %v3229_v1 = vpop.f32.mrb[1].mxu1  ;;  %v357_v5 = vadd.f32 %v356_v61, %v182_v59  ;;  %v400_v6 = vadd.f32 %v399_v62, %v190_v60 }
 0x254   :  { %v360_v2 = vpop.f32.mrb[2].mxu0  ;;  %v402_v3 = vpop.f32.mrb[2].mxu1  ;;  %v359_v11 = vadd.f32 %v358_v0, %v186_v63 }
 0x255   :  { %v361_v7 = vadd.f32 %v360_v2, %v182_v59  ;;  %v403_v8 = vadd.f32 %v402_v3, %v190_v60  ;;  %v362_v9 = vpop.f32.mrb[3].mxu0  ;;  %v3230_v10 = vpop.f32.mrb[3].mxu1 }
 0x256   :  { %v363_v12 = vadd.f32 %v362_v9, %v186_v63 }
 0x257   :  { %v406_v13 = vpack.c.bf16 %v361_v7, %v357_v5  ;;  %v3998_v14 = vpack.c.bf16 %v403_v8, %v400_v6 }
 0x258   :  { %v407_v15 = vpack.c.bf16 %v363_v12, %v359_v11 }
 0x259   :  { %526 = vrot.lane.b32.xlu1 %v406_v13, %s3804_s28 }
 0x25a   :  { %529 = vrot.lane.b32.xlu0 %v407_v15, %s3804_s28  ;;  %v414_v16 = vsel %vm409_vm1, %v407_v15, 0 }
 0x25b   :  { %3232 = vmatpush3.bf16.xpose.msra.mxu1 %v414_v16 }
 0x25c   :  { %3237 = vmatprep.subr.bf16.mxu1 %v3801_v4 }
 0x25d   :  { %651 = vrot.lane.b32.xlu1 %v407_v15, %s4421_s5 }
 0x25e   :  { %772 = vrot.lane.b32.xlu0 %v407_v15, %s3805_s29 }
 0x261   :  { %649 = vrot.lane.b32.xlu1 %v406_v13, %s4421_s5 }
 0x262   :  { %3234 = vmatmul.mubr.msk.bf16.vlgmr.msra.gmra.mrb[4].mxu1 %vm409_vm1, %v406_v13 }
 0x263   :  { %3238 = vmatpush3.bf16.msra.mxu1 %v3998_v14  ;;  %3239 = vmatprep.mubr.msk.bf16.mxu1 %vm3803_vm0, %v3801_v4 }
 0x264   :  { %3249 = vmatprep.subr.bf16.mxu1 %v3801_v4 }
 0x265   :  { %770 = vrot.lane.b32.xlu1 %v406_v13, %s3805_s29 }
 0x2cb   :  { %v527_v17 = vpop.permute.xlu1 %526 }
 0x2cc   :  { %v530_v18 = vpop.permute.xlu0 %529 }
 0x2cd   :  { %v535_v19 = vsel %vm409_vm1, %v530_v18, 0 }
 0x2ce   :  { %3244 = vmatpush3.bf16.xpose.msra.mxu0 %v535_v19 }
 0x2cf   :  { %3255 = vmatprep.subr.bf16.mxu0 %v3801_v4  ;;  %v652_v20 = vpop.permute.xlu1 %651 }
 0x2d0   :  { %v657_v21 = vsel %vm409_vm1, %v652_v20, 0  ;;  %v773_v22 = vpop.permute.xlu0 %772 }
 0x2d1   :  { %v778_v24 = vsel %vm409_vm1, %v773_v22, 0 }
 0x2d3   :  { %v650_v23 = vpop.permute.xlu1 %649 }
 0x2d5   :  { %3246 = vmatmul.mubr.msk.bf16.vlgmr.msra.gmra.mrb[4].mxu0 %vm409_vm1, %v527_v17 }
 0x2d6   :  { %3256 = vmatpush3.bf16.xpose.msra.mxu0 %v657_v21  ;;  %3257 = vmatprep.mubr.msk.bf16.mxu0 %vm3803_vm0, %v3801_v4 }
 0x2d7   :  { %3267 = vmatprep.subr.bf16.mxu0 %v3801_v4  ;;  %v771_v25 = vpop.permute.xlu1 %770 }
 0x2dd   :  { %3258 = vmatmul.mubr.msk.bf16.vlgmr.msra.gmra.mrb[8].mxu0 %vm409_vm1, %v650_v23 }
 0x2de   :  { %3268 = vmatpush3.bf16.xpose.msra.mxu0 %v778_v24  ;;  %3269 = vmatprep.mubr.msk.bf16.mxu0 %vm3803_vm0, %v3801_v4 }
 0x2df   :  { %3279 = vmatprep.subr.bf16.mxu0 %v3801_v4 }
 0x2e5   :  { %3270 = vmatmul.mubr.msk.bf16.vlgmr.msra.gmra.mrb[12].mxu0 %vm409_vm1, %v771_v25 }
 0x2e6   :  { %3295 = vmatprep.mubr.msk.bf16.mxu0 %vm3803_vm0, %v3801_v4 }
 0x335   :  { %v450_v27 = vpop.f32.mrb[4].mxu1 }
 0x336   :  { %v451_v29 = vadd.f32 %v450_v27, %v143_v26  ;;  %v3235_v30 = vpop.f32.mrb[5].mxu1 }
 0x337   :  { %v453_v31 = vpop.f32.mrb[6].mxu1 }
 0x338   :  { %v454_v32 = vadd.f32 %v453_v31, %v144_v28  ;;  %v3236_v33 = vpop.f32.mrb[7].mxu1  ;;  %v458_v34 = vsel %vm457_vm2, %v451_v29, -inf }
 0x339   :  { %459 = vmax.xlane.f32.xlu0 %v458_v34 }
 0x33a   :  { %v461_v36 = vsel %vm457_vm2, %v454_v32, -inf }
 0x33b   :  { %462 = vmax.xlane.f32.xlu1 %v461_v36 }
 0x3a8   :  { %v571_v37 = vpop.f32.mrb[4].mxu0 }
 0x3a9   :  { %v572_v38 = vadd.f32 %v571_v37, %v143_v26  ;;  %v3247_v39 = vpop.f32.mrb[5].mxu0 }
 0x3aa   :  { %v574_v40 = vpop.f32.mrb[6].mxu0 }
 0x3ab   :  { %v575_v41 = vadd.f32 %v574_v40, %v144_v28  ;;  %v3248_v42 = vpop.f32.mrb[7].mxu0  ;;  %v578_v43 = vsel %vm457_vm2, %v572_v38, -inf }
 0x3ac   :  { %579 = vmax.xlane.f32.xlu0 %v578_v43 }
 0x3ad   :  { %v581_v44 = vsel %vm457_vm2, %v575_v41, -inf }
 0x3b0   :  { %v693_v45 = vpop.f32.mrb[8].mxu0  ;;  %582 = vmax.xlane.f32.xlu0 %v581_v44 }
 0x3b1   :  { %v694_v46 = vadd.f32 %v693_v45, %v143_v26  ;;  %v3259_v47 = vpop.f32.mrb[9].mxu0 }
 0x3b2   :  { %v696_v48 = vpop.f32.mrb[10].mxu0 }
 0x3b3   :  { %v697_v49 = vadd.f32 %v696_v48, %v144_v28  ;;  %v3260_v50 = vpop.f32.mrb[11].mxu0  ;;  %v700_v51 = vsel %vm457_vm2, %v694_v46, -inf }
 0x3b4   :  { %701 = vmax.xlane.f32.xlu0 %v700_v51 }
 0x3b5   :  { %v703_v53 = vsel %vm457_vm2, %v697_v49, -inf }
 0x3b6   :  { %704 = vmax.xlane.f32.xlu1 %v703_v53 }
 0x3b8   :  { %v814_v57 = vpop.f32.mrb[12].mxu0 }
 0x3b9   :  { %v815_v59 = vadd.f32 %v814_v57, %v143_v26  ;;  %v3271_v60 = vpop.f32.mrb[13].mxu0 }
 0x3ba   :  { %v817_v61 = vpop.f32.mrb[14].mxu0 }
 0x3bb   :  { %v4040_v62 = vadd.f32 %v817_v61, %v144_v28  ;;  %v3272_v63 = vpop.f32.mrb[15].mxu0  ;;  %v821_v0 = vsel %vm457_vm2, %v815_v59, -inf }
 0x3bc   :  { %822 = vmax.xlane.f32.xlu0 %v821_v0 }
 0x3bd   :  { %v824_v1 = vsel %vm457_vm2, %v4040_v62, -inf }
 0x3be   :  { %825 = vmax.xlane.f32.xlu1 %v824_v1 }
 0x3c6   :  { %v460_v2 = vpop.xlane.xlu0 %459 }
 0x3c7   :  { %v464_v3 = vsub.f32 %v451_v29, %v460_v2 }
 0x3c8   :  { %v463_v5 = vpop.xlane.xlu1 %462 }
 0x3c9   :  { %v466_v6 = vmul.f32 1.442695, %v464_v3  ;;  %v465_v7 = vsub.f32 %v454_v32, %v463_v5 }
 0x3cb   :  { %3600 = vpow2.f32 %v466_v6  ;;  %v468_v8 = vmul.f32 1.442695, %v465_v7 }
 0x3cd   :  { %3602 = vpow2.f32 %v468_v8 }
 0x3d5   :  { %v3601_v9 = vpop.eup %3600 }
 0x3d6   :  { %v470_v10 = vsel %vm457_vm2, %v3601_v9, 0.0 }
 0x3d7   :  { %v3603_v11 = vpop.eup %3602  ;;  %471 = vadd.xlane.f32.xlu0 %v470_v10 }
 0x3d8   :  { %v473_v12 = vsel %vm457_vm2, %v3603_v11, 0.0 }
 0x3d9   :  { %474 = vadd.xlane.f32.xlu1 %v473_v12 }
 0x439   :  { %v580_v13 = vpop.xlane.xlu0 %579 }
 0x43a   :  { %v584_v15 = vsub.f32 %v572_v38, %v580_v13 }
 0x43c   :  { %v586_v16 = vmul.f32 1.442695, %v584_v15 }
 0x43d   :  { %v583_v17 = vpop.xlane.xlu0 %582 }
 0x43e   :  { %3604 = vpow2.f32 %v586_v16  ;;  %v585_v18 = vsub.f32 %v575_v41, %v583_v17 }
 0x440   :  { %v588_v19 = vmul.f32 1.442695, %v585_v18 }
 0x441   :  { %v702_v20 = vpop.xlane.xlu0 %701 }
 0x442   :  { %3606 = vpow2.f32 %v588_v19  ;;  %v706_v21 = vsub.f32 %v694_v46, %v702_v20 }
 0x443   :  { %v705_v22 = vpop.xlane.xlu1 %704 }
 0x444   :  { %v708_v23 = vmul.f32 1.442695, %v706_v21  ;;  %v707_v24 = vsub.f32 %v697_v49, %v705_v22 }
 0x446   :  { %3608 = vpow2.f32 %v708_v23  ;;  %v710_v25 = vmul.f32 1.442695, %v707_v24 }
 0x448   :  { %v3605_v26 = vpop.eup %3604  ;;  %3610 = vpow2.f32 %v710_v25  ;;  %v3468_v25 = vld [vmem:[#allocation5] sm:$0xff]  }
 0x449   :  { %v823_v27 = vpop.xlane.xlu0 %822  ;;  %v590_v28 = vsel %vm457_vm2, %v3605_v26, 0.0  ;;  %3280 = vmatpush3.bf16.msra.mxu0 %v3468_v25 }
 0x44a   :  { %v827_v29 = vsub.f32 %v815_v59, %v823_v27  ;;  %591 = vadd.xlane.f32.xlu0 %v590_v28  ;;  %v3469_v28 = vld [vmem:[#allocation5 + $0x8] sm:$0xff]   ;;  %3281 = vmatprep.subr.bf16.mxu0 %v3801_v4 }
 0x44b   :  { %v826_v40 = vpop.xlane.xlu1 %825 }
 0x44c   :  { %v3607_v30 = vpop.eup %3606  ;;  %v829_v31 = vmul.f32 1.442695, %v827_v29  ;;  %v828_v47 = vsub.f32 %v4040_v62, %v826_v40  ;;  %v3475_v40 = vld [vmem:[#allocation5 + $0x38] sm:$0xff]  }
 0x44d   :  { %v593_v32 = vsel %vm457_vm2, %v3607_v30, 0.0  ;;  %3282 = vmatpush3.bf16.msra.mxu0 %v3469_v28  ;;  %v3487_v28 = vld [vmem:[%s4408_s11 + $0x34] ss:$8 sps:$4 sm:$0xff]  }
 0x44e   :  { %3612 = vpow2.f32 %v829_v31  ;;  %594 = vadd.xlane.f32.xlu1 %v593_v32  ;;  %v831_v49 = vmul.f32 1.442695, %v828_v47  ;;  %3283 = vmatprep.subr.bf16.mxu0 %v3801_v4 }
 0x450   :  { %v3609_v33 = vpop.eup %3608 }
 0x451   :  { %v712_v34 = vsel %vm457_vm2, %v3609_v33, 0.0 }
 0x452   :  { %v3611_v36 = vpop.eup %3610  ;;  %713 = vadd.xlane.f32.xlu0 %v712_v34 }
 0x453   :  { %v715_v37 = vsel %vm457_vm2, %v3611_v36, 0.0 }
 0x454   :  { %716 = vadd.xlane.f32.xlu1 %v715_v37  ;;  %v3472_v37 = vld [vmem:[#allocation5 + $0x20] sm:$0xff]  }
 0x458   :  { %v3613_v38 = vpop.eup %3612 }
 0x459   :  { %v833_v39 = vsel %vm457_vm2, %v3613_v38, 0.0 }
 0x45a   :  { %834 = vadd.xlane.f32.xlu0 %v833_v39  ;;  %v3474_v39 = vld [vmem:[#allocation5 + $0x30] sm:$0xff]  }
 0x464   :  { %v472_v41 = vpop.xlane.xlu0 %471 }
 0x465   :  { %3614 = vrcp.f32 %v472_v41  ;;  %723 = vrot.lane.b32.xlu1 %v3998_v14, %s4421_s5 }
 0x466   :  { %v475_v42 = vpop.xlane.xlu1 %474 }
 0x467   :  { %3616 = vrcp.f32 %v475_v42 }
 0x468   :  { %3618 = vpow2.f32 %v831_v49 }
 0x46f   :  { %v3615_v43 = vpop.eup %3614 }
 0x470   :  { %602 = vrot.lane.b32.xlu0 %v3998_v14, %s3804_s28  ;;  %v478_v45 = vmul.f32 %v3615_v43, %v3601_v9 }
 0x471   :  { %v3617_v44 = vpop.eup %3616 }
 0x472   :  { %v479_v46 = vmul.f32 %v3617_v44, %v3603_v11  ;;  %v3619_v50 = vpop.eup %3618 }
 0x473   :  { %v836_v51 = vsel %vm457_vm2, %v3619_v50, 0.0 }
 0x474   :  { %v480_v48 = vpack.c.bf16 %v479_v46, %v478_v45 }
 0x476   :  { %3240 = vmatmul.mubr.msk.bf16.vlgmr.msra.gmra.mrb[8].mxu1 %vm457_vm2, %v480_v48 }
 0x477   :  { %3251 = vmatprep.mubr.msk.bf16.mxu1 %vm3803_vm0, %v3801_v4 }
 0x489   :  { %837 = vadd.xlane.f32.xlu1 %v836_v51 }
 0x49a   :  { %844 = vrot.lane.b32.xlu1 %v3998_v14, %s3805_s29 }
 0x4d7   :  { %v592_v53 = vpop.xlane.xlu0 %591 }
 0x4db   :  { %v595_v57 = vpop.xlane.xlu1 %594 }
 0x4dc   :  { %3620 = vrcp.f32 %v595_v57 }
 0x4dd   :  { %3622 = vrcp.f32 %v592_v53 }
 0x4df   :  { %v714_v60 = vpop.xlane.xlu0 %713 }
 0x4e1   :  { %v717_v59 = vpop.xlane.xlu1 %716 }
 0x4e2   :  { %3624 = vrcp.f32 %v717_v59 }
 0x4e3   :  { %3626 = vrcp.f32 %v714_v60 }
 0x4e5   :  { %v724_v14 = vpop.permute.xlu1 %723 }
 0x4e6   :  { %v3621_v61 = vpop.eup %3620 }
 0x4e7   :  { %v835_v62 = vpop.xlane.xlu0 %834  ;;  %v3623_v63 = vpop.eup %3622  ;;  %v599_v0 = vmul.f32 %v3621_v61, %v3607_v30  ;;  %v3470_v30 = vld [vmem:[#allocation5 + $0x10] sm:$0xff]  }
 0x4e8   :  { %v598_v1 = vmul.f32 %v3623_v63, %v3605_v26  ;;  %3628 = vrcp.f32 %v835_v62  ;;  %3284 = vmatpush3.bf16.msra.mxu0 %v3470_v30  ;;  %v3490_v30 = vld [vmem:[%s4408_s11 + $0x44] ss:$8 sps:$4 sm:$0xff]  }
 0x4e9   :  { %3285 = vmatprep.subr.bf16.mxu0 %v3801_v4 }
 0x4ea   :  { %v600_v3 = vpack.c.bf16 %v599_v0, %v598_v1 }
 0x4eb   :  { %v603_v2 = vpop.permute.xlu0 %602 }
 0x4ec   :  { %3250 = vmatpush3.bf16.msra.mxu1 %v603_v2  ;;  %v3625_v5 = vpop.eup %3624 }
 0x4ed   :  { %3261 = vmatprep.subr.bf16.mxu1 %v3801_v4  ;;  %v3627_v6 = vpop.eup %3626  ;;  %v721_v7 = vmul.f32 %v3625_v5, %v3611_v36  ;;  %v3471_v36 = vld [vmem:[#allocation5 + $0x18] sm:$0xff]  }
 0x4ee   :  { %v720_v8 = vmul.f32 %v3627_v6, %v3609_v33  ;;  %3286 = vmatpush3.bf16.msra.mxu0 %v3471_v36  ;;  %v3494_v36 = vld [vmem:[%s4408_s11 + $0x60] ss:$8 sps:$4 sm:$0xff]  }
 0x4ef   :  { %3252 = vmatmul.mubr.msk.bf16.vlgmr.msra.gmra.mrb[12].mxu1 %vm457_vm2, %v600_v3  ;;  %3287 = vmatprep.subr.bf16.mxu0 %v3801_v4  ;;  %v2948_v3 = vld [vmem:[%s4405_s8] ss:$0 sm:$0xff] }
 0x4f0   :  { %3262 = vmatpush3.bf16.msra.mxu1 %v724_v14  ;;  %3263 = vmatprep.mubr.msk.bf16.mxu1 %vm3803_vm0, %v3801_v4  ;;  %v722_v9 = vpack.c.bf16 %v721_v7, %v720_v8  ;;  %v1036_v7 = vunpack.c.l.bf16 %v3974_v52 }
 0x4f1   :  { %3273 = vmatprep.subr.bf16.mxu1 %v3801_v4 }
 0x4f2   :  { %v3629_v12 = vpop.eup %3628  ;;  %3288 = vmatpush3.bf16.msra.mxu0 %v3472_v37  ;;  %v3499_v37 = vld [vmem:[%s4408_s11 + $0x74] ss:$8 sps:$4 sm:$0xff]  }
 0x4f3   :  { %v841_v15 = vmul.f32 %v3629_v12, %v3613_v38  ;;  %v3473_v38 = vld [vmem:[#allocation5 + $0x28] sm:$0xff]   ;;  %3289 = vmatprep.subr.bf16.mxu0 %v3801_v4  ;;  %v1037_v12 = vunpack.c.h.bf16 %v3974_v52 }
 0x4f4   :  { %v3479_v52 = vld [vmem:[%s4408_s11 + $0x10] ss:$8 sps:$4 sm:$0xff]  }
 0x4f6   :  { %3290 = vmatpush3.bf16.msra.mxu0 %v3473_v38  ;;  %v3497_v38 = vld [vmem:[%s4408_s11 + $0x70] ss:$8 sps:$4 sm:$0xff]  }
 0x4f7   :  { %3264 = vmatmul.mubr.msk.bf16.vlgmr.msra.gmra.mrb[16].mxu1 %vm457_vm2, %v722_v9  ;;  %3291 = vmatprep.subr.bf16.mxu0 %v3801_v4 }
 0x4f8   :  { %3275 = vmatprep.mubr.msk.bf16.mxu1 %vm3803_vm0, %v3801_v4 }
 0x4fa   :  { %3292 = vmatpush3.bf16.msra.mxu0 %v3474_v39 }
 0x4fb   :  { %3293 = vmatprep.subr.bf16.mxu0 %v3801_v4 }
 0x4fe   :  { %3294 = vmatpush3.bf16.msra.mxu0 %v3475_v40 }
 0x516   :  { %v838_v10 = vpop.xlane.xlu1 %837 }
 0x517   :  { %3630 = vrcp.f32 %v838_v10 }
 0x51a   :  { %v845_v11 = vpop.permute.xlu1 %844 }
 0x51b   :  { %3274 = vmatpush3.bf16.msra.mxu1 %v845_v11 }
 0x521   :  { %v3631_v13 = vpop.eup %3630 }
 0x522   :  { %v842_v16 = vmul.f32 %v3631_v13, %v3619_v50 }
 0x524   :  { %v843_v17 = vpack.c.bf16 %v842_v16, %v841_v15  ;;  %v3476_v15 = vld [vmem:[%s4408_s11] ss:$8 sps:$4 sm:$0xff]   ;;  %v3478_v16 = vld [vmem:[%s4408_s11 + $0x4] ss:$8 sps:$4 sm:$0xff]  }
 0x525   :  { %1189 = vmatprep.subr.bf16.mxu1 %v3478_v16 }
 0x526   :  { %3276 = vmatmul.mubr.msk.bf16.vlgmr.msra.gmra.mrb[20].mxu1 %vm457_vm2, %v843_v17  ;;  %v3481_v17 = vld [vmem:[%s4408_s11 + $0x14] ss:$8 sps:$4 sm:$0xff]  }
 0x527   :  { %1221 = vmatprep.mubr.bf16.mxu1 %v3802_v35  ;;  %1190 = vmatpush1.bf16.msra.mxu1 %v3476_v15 }
 0x528   :  { %1191 = vmatprep.subr.bf16.mxu1 %v3481_v17 }
 0x52b   :  { %1192 = vmatpush1.bf16.msra.mxu1 %v3479_v52 }
 0x549   :  { %v518_v18 = vpop.f32.mrb[8].mxu1 }
 0x54a   :  { %v3241_v19 = vpop.f32.mrb[9].mxu1 }
 0x54b   :  { %v521_v20 = vpop.f32.mrb[10].mxu1 }
 0x54c   :  { %v3242_v21 = vpop.f32.mrb[11].mxu1 }
 0x5c2   :  { %v642_v22 = vpop.f32.mrb[12].mxu1 }
 0x5c3   :  { %v3253_v23 = vpop.f32.mrb[13].mxu1 }
 0x5c4   :  { %v645_v24 = vpop.f32.mrb[14].mxu1 }
 0x5c5   :  { %v3406_v26 = vpack.i.bf16 %v645_v24, %v642_v22  ;;  %v3254_v27 = vpop.f32.mrb[15].mxu1 }
 0x5c6   :  { %v3482_v27 = vld [vmem:[%s4408_s11 + $0x20] ss:$8 sps:$4 sm:$0xff]  }
 0x5c7   :  { %3407 = vrot.lane.b32.xlu1 %v3406_v26, %s3805_s29  ;;  %v3484_v26 = vld [vmem:[%s4408_s11 + $0x24] ss:$8 sps:$4 sm:$0xff]  }
 0x5c8   :  { %1193 = vmatprep.subr.bf16.mxu1 %v3484_v26 }
 0x5c9   :  { %1194 = vmatpush1.bf16.msra.mxu1 %v3482_v27 }
 0x5ca   :  { %v763_v29 = vpop.f32.mrb[16].mxu1  ;;  %1195 = vmatprep.subr.bf16.mxu1 %v3487_v28 }
 0x5cb   :  { %v3265_v31 = vpop.f32.mrb[17].mxu1 }
 0x5cc   :  { %v766_v32 = vpop.f32.mrb[18].mxu1  ;;  %v3488_v31 = vld [vmem:[%s4408_s11 + $0x40] ss:$8 sps:$4 sm:$0xff]  }
 0x5cd   :  { %v3411_v33 = vpack.i.bf16 %v766_v32, %v763_v29  ;;  %v3266_v34 = vpop.f32.mrb[19].mxu1  ;;  %v3485_v29 = vld [vmem:[%s4408_s11 + $0x30] ss:$8 sps:$4 sm:$0xff]   ;;  %v3493_v32 = vld [vmem:[%s4408_s11 + $0x54] ss:$8 sps:$4 sm:$0xff]  }
 0x5ce   :  { %1196 = vmatpush1.bf16.msra.mxu1 %v3485_v29  ;;  %v3496_v34 = vld [vmem:[%s4408_s11 + $0x64] ss:$8 sps:$4 sm:$0xff]  }
 0x5cf   :  { %3412 = vrot.lane.b32.xlu0 %v3411_v33, %s4421_s5  ;;  %1197 = vmatprep.subr.bf16.mxu1 %v3490_v30  ;;  %v3491_v33 = vld [vmem:[%s4408_s11 + $0x50] ss:$8 sps:$4 sm:$0xff]  }
 0x5d2   :  { %1198 = vmatpush1.bf16.msra.mxu1 %v3488_v31 }
 0x5d3   :  { %1199 = vmatprep.subr.bf16.mxu1 %v3493_v32 }
 0x5d6   :  { %1200 = vmatpush1.bf16.msra.mxu1 %v3491_v33 }
 0x5d7   :  { %1201 = vmatprep.subr.bf16.mxu1 %v3496_v34 }
 0x5da   :  { %1202 = vmatpush1.bf16.msra.mxu1 %v3494_v36 }
 0x5db   :  { %1203 = vmatprep.subr.bf16.mxu1 %v3499_v37 }
 0x5de   :  { %1204 = vmatpush1.bf16.msra.mxu1 %v3497_v38 }
 0x5f9   :  { %v884_v41 = vpop.f32.mrb[20].mxu1 }
 0x5fa   :  { %v3277_v42 = vpop.f32.mrb[21].mxu1 }
 0x5fb   :  { %v887_v43 = vpop.f32.mrb[22].mxu1 }
 0x5fc   :  { %v3416_v44 = vpack.i.bf16 %v887_v43, %v884_v41  ;;  %v3278_v45 = vpop.f32.mrb[23].mxu1 }
 0x5fe   :  { %3417 = vrot.lane.b32.xlu1 %v3416_v44, %s3804_s28 }
 0x639   :  { %v3408_v46 = vpop.permute.xlu1 %3407 }
 0x63a   :  { %v3410_v48 = vunpack.i.h.bf16 %v3408_v46  ;;  %v3409_v49 = vunpack.i.l.bf16 %v3408_v46 }
 0x63c   :  { %v916_v57 = vsel %vm409_vm1, %v521_v20, %v3410_v48  ;;  %v915_v59 = vsel %vm409_vm1, %v518_v18, %v3409_v49 }
 0x641   :  { %v3413_v47 = vpop.permute.xlu0 %3412 }
 0x642   :  { %v3415_v50 = vunpack.i.h.bf16 %v3413_v47  ;;  %v3414_v51 = vunpack.i.l.bf16 %v3413_v47  ;;  %v2957_v47 = vld [vmem:[%s4406_s9] ss:$0 sm:$0xff] }
 0x644   :  { %v919_v62 = vsel %vm917_vm3, %v916_v57, %v3415_v50  ;;  %v918_v63 = vsel %vm917_vm3, %v915_v59, %v3414_v51  ;;  %v2958_v51 = vld [vmem:[%s4407_s10] ss:$0 sm:$0xff] }
 0x670   :  { %v3418_v53 = vpop.permute.xlu1 %3417 }
 0x671   :  { %v3420_v60 = vunpack.i.h.bf16 %v3418_v53  ;;  %v3419_v61 = vunpack.i.l.bf16 %v3418_v53 }
 0x673   :  { %v922_v0 = vsel %vm920_vm4, %v919_v62, %v3420_v60  ;;  %v921_v1 = vsel %vm920_vm4, %v918_v63, %v3419_v61  ;;  %v3500_v61 = vld [vmem:[#allocation7 + $0x40] sm:$0xff]   ;;  %v3502_v63 = vld [vmem:[#allocation7 + $0x48] sm:$0xff]  }
 0x674   :  { %v923_v2 = vpack.c.bf16 %v922_v0, %v921_v1  ;;  %v3501_v62 = vld [vmem:[#allocation7] sm:$0xff]   ;;  %3131 = vmatprep.subr.bf16.mxu0 %v3500_v61  ;;  %v3503_v0 = vld [vmem:[#allocation7 + $0x8] sm:$0xff]   ;;  %v3504_v1 = vld [vmem:[#allocation7 + $0x50] sm:$0xff]  }
 0x676   :  { %3296 = vmatmul.mubr.bf16.vlgmr.msra.gmra.mrb[16].mxu0 %v923_v2  ;;  %v3505_v2 = vld [vmem:[#allocation7 + $0x10] sm:$0xff]  }
 0x677   :  { %3132 = vmatpush3.bf16.msra.mxu0 %v3501_v62 }
 0x678   :  { %3133 = vmatprep.subr.bf16.mxu0 %v3502_v63 }
 0x67b   :  { %3134 = vmatpush3.bf16.msra.mxu0 %v3503_v0 }
 0x67c   :  { %3135 = vmatprep.subr.bf16.mxu0 %v3504_v1 }
 0x67f   :  { %3136 = vmatpush3.bf16.msra.mxu0 %v3505_v2 }
 0x749   :  { %v1029_v5 = vpop.f32.mrb[16].mxu0 }
 0x74a   :  { %v1030_v14 = vadd.f32 %v2948_v3, %v1029_v5  ;;  %v3297_v6 = vpop.f32.mrb[17].mxu0  ;;  %v3507_v5 = vld [vmem:[#allocation7 + $0x18] sm:$0xff]  }
 0x74b   :  { %v1032_v8 = vpop.f32.mrb[18].mxu0  ;;  %v3509_v6 = vld [vmem:[#allocation7 + $0x20] sm:$0xff]  }
 0x74c   :  { %v1033_v9 = vadd.f32 %v2948_v3, %v1032_v8  ;;  %v3298_v10 = vpop.f32.mrb[19].mxu0  ;;  %v1038_v11 = vadd.f32 %v1036_v7, %v1030_v14  ;;  %v3506_v3 = vld [vmem:[#allocation7 + $0x58] sm:$0xff]   ;;  %v3508_v14 = vld [vmem:[#allocation7 + $0x60] sm:$0xff]   ;;  %v3510_v7 = vld [vmem:[#allocation7 + $0x68] sm:$0xff]  }
 0x74d   :  { %3137 = vmatprep.subr.bf16.mxu0 %v3506_v3  ;;  %v3511_v8 = vld [vmem:[#allocation7 + $0x28] sm:$0xff]   ;;  %v3513_v10 = vld [vmem:[#allocation7 + $0x30] sm:$0xff]  }
 0x74e   :  { %1042 = vadd.xlane.f32.xlu0 %v1038_v11  ;;  %v1039_v13 = vadd.f32 %v1037_v12, %v1033_v9  ;;  %3138 = vmatpush3.bf16.msra.mxu0 %v3507_v5  ;;  %v3512_v9 = vld [vmem:[#allocation7 + $0x70] sm:$0xff]   ;;  %v3515_v12 = vld [vmem:[#allocation7 + $0x38] sm:$0xff]  }
 0x74f   :  { %3139 = vmatprep.subr.bf16.mxu0 %v3508_v14 }
 0x750   :  { %1044 = vadd.xlane.f32.xlu1 %v1039_v13 }
 0x752   :  { %3140 = vmatpush3.bf16.msra.mxu0 %v3509_v6  ;;  %v2975_v6 = vld [vmem:[%s4411_s14] ss:$0 sm:$0xff] }
 0x753   :  { %3141 = vmatprep.subr.bf16.mxu0 %v3510_v7 }
 0x756   :  { %3142 = vmatpush3.bf16.msra.mxu0 %v3511_v8 }
 0x757   :  { %3143 = vmatprep.subr.bf16.mxu0 %v3512_v9 }
 0x75a   :  { %3144 = vmatpush3.bf16.msra.mxu0 %v3513_v10 }
 0x7db   :  { %v1043_v18 = vpop.xlane.xlu0 %1042 }
 0x7dc   :  { %v1046_v19 = vmul.f32 0.0078125, %v1043_v18 }
 0x7dd   :  { %v1045_v20 = vpop.xlane.xlu1 %1044 }
 0x7de   :  { %v1048_v21 = vsub.f32 %v1038_v11, %v1046_v19  ;;  %v1047_v22 = vmul.f32 0.0078125, %v1045_v20  ;;  %v3514_v11 = vld [vmem:[#allocation7 + $0x78] sm:$0xff]  }
 0x7df   :  { %3145 = vmatprep.subr.bf16.mxu0 %v3514_v11 }
 0x7e0   :  { %v1049_v23 = vsub.f32 %v1039_v13, %v1047_v22  ;;  %v1050_v24 = vmul.f32 %v1048_v21, %v1048_v21  ;;  %3146 = vmatpush3.bf16.msra.mxu0 %v3515_v12  ;;  %v1097_v13 = vld [vmem:[%s4409_s12] sm:$0x3] }
 0x7e1   :  { %3299 = vmatprep.subr.bf16.mxu0 %v3801_v4  ;;  %v1102_v15 = vrot.slane %v1097_v13, %v3985_v55  ;;  %v1106_v16 = vrot.slane %v1097_v13, %v3992_v58 }
 0x7e2   :  { %1052 = vadd.xlane.f32.xlu0 %v1050_v24  ;;  %v1051_v25 = vmul.f32 %v1049_v23, %v1049_v23 }
 0x7e6   :  { %1054 = vadd.xlane.f32.xlu0 %v1051_v25 }
 0x86f   :  { %v1053_v39 = vpop.xlane.xlu0 %1052 }
 0x870   :  { %v1056_v40 = vmul.f32 0.0078125, %v1053_v39 }
 0x872   :  { %v1058_v41 = vadd.f32 1e-12, %v1056_v40 }
 0x873   :  { %v1055_v42 = vpop.xlane.xlu0 %1054 }
 0x874   :  { %3632 = vrsqrt.f32 %v1058_v41  ;;  %v1057_v43 = vmul.f32 0.0078125, %v1055_v42 }
 0x876   :  { %v1059_v44 = vadd.f32 1e-12, %v1057_v43 }
 0x878   :  { %3634 = vrsqrt.f32 %v1059_v44 }
 0x87e   :  { %v3633_v45 = vpop.eup %3632 }
 0x87f   :  { %v1062_v46 = vmul.f32 %v3633_v45, %v1048_v21 }
 0x881   :  { %v1070_v50 = vmul.f32 %v2957_v47, %v1062_v46 }
 0x882   :  { %v3635_v48 = vpop.eup %3634 }
 0x883   :  { %v1063_v49 = vmul.f32 %v3635_v48, %v1049_v23  ;;  %v1078_v57 = vadd.f32 %v2958_v51, %v1070_v50 }
 0x885   :  { %v1071_v53 = vmul.f32 %v2957_v47, %v1063_v49 }
 0x887   :  { %v1079_v59 = vadd.f32 %v2958_v51, %v1071_v53 }
 0x889   :  { %v4148_v60 = vpack.c.bf16 %v1079_v59, %v1078_v57 }
 0x88b   :  { %1222 = vmatmul.mubr.bf16.vlgmr.msra.gmra.mrb[24].mxu1 %v4148_v60  ;;  %v1446_v13 = vunpack.c.l.bf16 %v4148_v60 }
 0x88c   :  { %1702 = vmatprep.mubr.bf16.mxu1 %v3802_v35 }
 0x95e   :  { %v1223_v17 = vpop.f32.mrb[24].mxu1 }
 0x95f   :  { %v1224_v52 = vadd.f32 %v1223_v17, %v1102_v15  ;;  %v1225_v18 = vpop.f32.mrb[25].mxu1  ;;  %v1447_v17 = vunpack.c.h.bf16 %v4148_v60 }
 0x960   :  { %v1226_v19 = vadd.f32 %v1225_v18, %v1106_v16  ;;  %v1227_v20 = vpop.f32.mrb[26].mxu1  ;;  %v3516_v18 = vld [vmem:[#allocation2 + $0xc0] ss:$12 sps:$4 sm:$0xff]  }
 0x961   :  { %v1232_v21 = vmul.f32 %v1224_v52, %v1224_v52  ;;  %v1228_v22 = vadd.f32 %v1227_v20, %v1102_v15  ;;  %v1229_v23 = vpop.f32.mrb[27].mxu1  ;;  %v3519_v20 = vld [vmem:[#allocation2 + $0xc8] ss:$12 sps:$4 sm:$0xff]  }
 0x962   :  { %v1233_v24 = vmul.f32 %v1226_v19, %v1226_v19  ;;  %v1230_v25 = vadd.f32 %v1229_v23, %v1106_v16  ;;  %v3520_v23 = vld [vmem:[#allocation2 + $0xd8] ss:$12 sps:$4 sm:$0xff]  }
 0x963   :  { %v1236_v26 = vmul.f32 %v1232_v21, %v1224_v52  ;;  %v1234_v27 = vmul.f32 %v1228_v22, %v1228_v22  ;;  %v3522_v21 = vld [vmem:[#allocation2 + $0xdc] ss:$12 sps:$4 sm:$0xff]  }
 0x964   :  { %v1237_v28 = vmul.f32 %v1233_v24, %v1226_v19  ;;  %v1235_v29 = vmul.f32 %v1230_v25, %v1230_v25 }
 0x965   :  { %v1240_v30 = vmul.f32 0.044715, %v1236_v26  ;;  %v1238_v31 = vmul.f32 %v1234_v27, %v1228_v22 }
 0x966   :  { %v1241_v32 = vmul.f32 0.044715, %v1237_v28  ;;  %v1239_v33 = vmul.f32 %v1235_v29, %v1230_v25 }
 0x967   :  { %v1244_v34 = vadd.f32 %v1240_v30, %v1224_v52  ;;  %v1242_v36 = vmul.f32 0.044715, %v1238_v31  ;;  %v3526_v31 = vld [vmem:[#allocation2 + $0xf4] ss:$12 sps:$4 sm:$0xff]  }
 0x968   :  { %v1245_v37 = vadd.f32 %v1241_v32, %v1226_v19  ;;  %v1243_v38 = vmul.f32 0.044715, %v1239_v33  ;;  %v3524_v32 = vld [vmem:[#allocation2 + $0xf0] ss:$12 sps:$4 sm:$0xff]   ;;  %v3527_v33 = vld [vmem:[#allocation2 + $0xf8] ss:$12 sps:$4 sm:$0xff]  }
 0x969   :  { %v1248_v39 = vmul.f32 0.7978846, %v1244_v34  ;;  %v1246_v40 = vadd.f32 %v1242_v36, %v1228_v22  ;;  %v3530_v34 = vld [vmem:[#allocation2 + $0x10c] ss:$12 sps:$4 sm:$0xff]   ;;  %v3528_v36 = vld [vmem:[#allocation2 + $0x108] ss:$12 sps:$4 sm:$0xff]  }
 0x96a   :  { %v1249_v41 = vmul.f32 0.7978846, %v1245_v37  ;;  %v1247_v42 = vadd.f32 %v1243_v38, %v1230_v25  ;;  %v3531_v37 = vld [vmem:[#allocation2 + $0x110] ss:$12 sps:$4 sm:$0xff]  }
 0x96b   :  { %3636 = vtanh.f32 %v1248_v39  ;;  %v1250_v43 = vmul.f32 0.7978846, %v1246_v40  ;;  %v3534_v38 = vld [vmem:[#allocation2 + $0x124] ss:$12 sps:$4 sm:$0xff]   ;;  %v3532_v39 = vld [vmem:[#allocation2 + $0x120] ss:$12 sps:$4 sm:$0xff]  }
 0x96c   :  { %3638 = vtanh.f32 %v1249_v41  ;;  %v1251_v44 = vmul.f32 0.7978846, %v1247_v42  ;;  %v3535_v40 = vld [vmem:[#allocation2 + $0x128] ss:$12 sps:$4 sm:$0xff]   ;;  %v3536_v42 = vld [vmem:[#allocation2 + $0x138] ss:$12 sps:$4 sm:$0xff]  }
 0x96d   :  { %3640 = vtanh.f32 %v1250_v43  ;;  %v3538_v41 = vld [vmem:[#allocation2 + $0x13c] ss:$12 sps:$4 sm:$0xff]   ;;  %v3539_v43 = vld [vmem:[#allocation2 + $0x140] ss:$12 sps:$4 sm:$0xff]  }
 0x96e   :  { %3642 = vtanh.f32 %v1251_v44  ;;  %v3542_v44 = vld [vmem:[#allocation2 + $0x154] ss:$12 sps:$4 sm:$0xff]  }
 0x975   :  { %v3637_v45 = vpop.eup %3636 }
 0x976   :  { %v3639_v46 = vpop.eup %3638  ;;  %v1256_v47 = vadd.f32 1.0, %v3637_v45  ;;  %v3540_v45 = vld [vmem:[#allocation2 + $0x150] ss:$12 sps:$4 sm:$0xff]  }
 0x977   :  { %v3641_v48 = vpop.eup %3640  ;;  %v1257_v49 = vadd.f32 1.0, %v3639_v46  ;;  %v3543_v46 = vld [vmem:[#allocation2 + $0x158] ss:$12 sps:$4 sm:$0xff]  }
 0x978   :  { %v3643_v50 = vpop.eup %3642  ;;  %v1260_v51 = vmul.f32 0.5, %v1256_v47  ;;  %v1258_v53 = vadd.f32 1.0, %v3641_v48  ;;  %v3546_v47 = vld [vmem:[#allocation2 + $0x16c] ss:$12 sps:$4 sm:$0xff]   ;;  %v3544_v48 = vld [vmem:[#allocation2 + $0x168] ss:$12 sps:$4 sm:$0xff]  }
 0x979   :  { %v1259_v57 = vadd.f32 1.0, %v3643_v50  ;;  %v1261_v59 = vmul.f32 0.5, %v1257_v49  ;;  %v3547_v49 = vld [vmem:[#allocation2 + $0x170] ss:$12 sps:$4 sm:$0xff]  }
 0x97a   :  { %v1262_v61 = vmul.f32 0.5, %v1258_v53  ;;  %v1264_v63 = vmul.f32 %v1260_v51, %v1224_v52 }
 0x97b   :  { %v1263_v62 = vmul.f32 0.5, %v1259_v57  ;;  %v1265_v1 = vmul.f32 %v1261_v59, %v1226_v19  ;;  %v3518_v19 = vld [vmem:[#allocation2 + $0xc4] ss:$12 sps:$4 sm:$0xff]  }
 0x97c   :  { %v1266_v0 = vmul.f32 %v1262_v61, %v1228_v22  ;;  %1670 = vmatprep.subr.bf16.mxu1 %v3518_v19  ;;  %v3523_v22 = vld [vmem:[#allocation2 + $0xe0] ss:$12 sps:$4 sm:$0xff]  }
 0x97d   :  { %v1267_v2 = vmul.f32 %v1263_v62, %v1230_v25  ;;  %1671 = vmatpush1.bf16.msra.mxu1 %v3516_v18 }
 0x97e   :  { %v1268_v3 = vpack.c.bf16 %v1266_v0, %v1264_v63  ;;  %1672 = vmatprep.subr.bf16.mxu1 %v3522_v21  ;;  %v2992_v63 = vld [vmem:[%s4412_s15] ss:$0 sm:$0xff] }
 0x97f   :  { %v1269_v5 = vpack.c.bf16 %v1267_v2, %v1265_v1 }
 0x981   :  { %1437 = vmatprep.mubr.bf16.mxu0 %v1269_v5  ;;  %1673 = vmatpush1.bf16.msra.mxu1 %v3520_v23  ;;  %v2993_v5 = vld [vmem:[%s4413_s16] ss:$0 sm:$0xff] }
 0x982   :  { %1438 = vmatmul.mubr.bf16.vlgmr.msra.gmra.mrb[20].mxu0 %v1268_v3  ;;  %1674 = vmatprep.subr.bf16.mxu1 %v3526_v31 }
 0x983   :  { %3315 = vmatprep.mubr.msk.bf16.mxu0 %vm3803_vm0, %v3801_v4  ;;  %3300 = vmatpush3.bf16.msra.mxu0 %v3519_v20 }
 0x984   :  { %3301 = vmatprep.subr.bf16.mxu0 %v3801_v4 }
 0x985   :  { %1675 = vmatpush1.bf16.msra.mxu1 %v3524_v32 }
 0x986   :  { %1676 = vmatprep.subr.bf16.mxu1 %v3530_v34 }
 0x987   :  { %3302 = vmatpush3.bf16.msra.mxu0 %v3523_v22 }
 0x988   :  { %3303 = vmatprep.subr.bf16.mxu0 %v3801_v4 }
 0x989   :  { %1677 = vmatpush1.bf16.msra.mxu1 %v3528_v36 }
 0x98a   :  { %1678 = vmatprep.subr.bf16.mxu1 %v3534_v38 }
 0x98b   :  { %3304 = vmatpush3.bf16.msra.mxu0 %v3527_v33  ;;  %v4213_v33 = vld [vmem:[%s4423_s18 + $0x8] sm:$0xff] }
 0x98c   :  { %3305 = vmatprep.subr.bf16.mxu0 %v3801_v4 }
 0x98d   :  { %1679 = vmatpush1.bf16.msra.mxu1 %v3532_v39 }
 0x98e   :  { %1680 = vmatprep.subr.bf16.mxu1 %v3538_v41 }
 0x98f   :  { %3306 = vmatpush3.bf16.msra.mxu0 %v3531_v37 }
 0x990   :  { %3307 = vmatprep.subr.bf16.mxu0 %v3801_v4 }
 0x991   :  { %1681 = vmatpush1.bf16.msra.mxu1 %v3536_v42 }
 0x992   :  { %1682 = vmatprep.subr.bf16.mxu1 %v3542_v44 }
 0x993   :  { %3308 = vmatpush3.bf16.msra.mxu0 %v3535_v40 }
 0x994   :  { %3309 = vmatprep.subr.bf16.mxu0 %v3801_v4 }
 0x995   :  { %1683 = vmatpush1.bf16.msra.mxu1 %v3540_v45 }
 0x996   :  { %1684 = vmatprep.subr.bf16.mxu1 %v3546_v47 }
 0x997   :  { %3310 = vmatpush3.bf16.msra.mxu0 %v3539_v43 }
 0x998   :  { %3311 = vmatprep.subr.bf16.mxu0 %v3801_v4 }
 0x999   :  { %1685 = vmatpush1.bf16.msra.mxu1 %v3544_v48 }
 0x99a   :  { %3319 = vmatprep.subr.bf16.mxu1 %v3801_v4 }
 0x99b   :  { %3312 = vmatpush3.bf16.msra.mxu0 %v3543_v46 }
 0x99c   :  { %3313 = vmatprep.subr.bf16.mxu0 %v3801_v4 }
 0x99f   :  { %3314 = vmatpush3.bf16.msra.mxu0 %v3547_v49 }
 0x9a0   :  { %3343 = vmatprep.subr.bf16.mxu0 %v3801_v4 }
 0xa55   :  { %v3147_v14 = vpop.f32.mrb[20].mxu0 }
 0xa56   :  { %v3148_v7 = vpop.f32.mrb[21].mxu0 }
 0xa57   :  { %v3149_v8 = vadd.f32 %v3148_v7, %v3147_v14  ;;  %v3150_v9 = vpop.f32.mrb[22].mxu0 }
 0xa58   :  { %v3151_v10 = vpop.f32.mrb[23].mxu0 }
 0xa59   :  { %v1440_v11 = vadd.f32 %v3149_v8, %v2975_v6  ;;  %v3152_v12 = vadd.f32 %v3151_v10, %v3150_v9  ;;  %v2994_v9 = vld [vmem:[%s4403_s6 + $0x3] sm:$0x7] }
 0xa5a   :  { %v1530_v10 = vrot.slane %v2994_v9, %v3985_v55 }
 0xa5b   :  { %v1443_v15 = vadd.f32 %v3152_v12, %v2975_v6  ;;  %v1448_v16 = vadd.f32 %v1446_v13, %v1440_v11  ;;  %v1538_v11 = vrot.slane %v2994_v9, %v189_v56 }
 0xa5d   :  { %1452 = vadd.xlane.f32.xlu0 %v1448_v16  ;;  %v1449_v52 = vadd.f32 %v1447_v17, %v1443_v15  ;;  %v1534_v15 = vrot.slane %v2994_v9, %v3992_v58 }
 0xa5f   :  { %1454 = vadd.xlane.f32.xlu1 %v1449_v52 }
 0xaea   :  { %v1453_v60 = vpop.xlane.xlu0 %1452 }
 0xaeb   :  { %v1456_v24 = vmul.f32 0.0078125, %v1453_v60 }
 0xaec   :  { %v1455_v25 = vpop.xlane.xlu1 %1454 }
 0xaed   :  { %v1458_v26 = vsub.f32 %v1448_v16, %v1456_v24  ;;  %v1457_v27 = vmul.f32 0.0078125, %v1455_v25 }
 0xaef   :  { %v1459_v28 = vsub.f32 %v1449_v52, %v1457_v27  ;;  %v1460_v29 = vmul.f32 %v1458_v26, %v1458_v26 }
 0xaf1   :  { %1462 = vadd.xlane.f32.xlu0 %v1460_v29  ;;  %v1461_v30 = vmul.f32 %v1459_v28, %v1459_v28  ;;  %v4207_v29 = vld [vmem:[%s4423_s18] sm:$0xff] }
 0xaf3   :  { %1464 = vadd.xlane.f32.xlu1 %v1461_v30 }
 0xb7e   :  { %v1463_v50 = vpop.xlane.xlu0 %1462 }
 0xb7f   :  { %v1466_v51 = vmul.f32 0.0078125, %v1463_v50 }
 0xb80   :  { %v1465_v53 = vpop.xlane.xlu1 %1464 }
 0xb81   :  { %v1468_v57 = vadd.f32 1e-12, %v1466_v51  ;;  %v1467_v59 = vmul.f32 0.0078125, %v1465_v53 }
 0xb83   :  { %3644 = vrsqrt.f32 %v1468_v57  ;;  %v1469_v61 = vadd.f32 1e-12, %v1467_v59 }
 0xb85   :  { %3646 = vrsqrt.f32 %v1469_v61 }
 0xb8d   :  { %v3645_v62 = vpop.eup %3644 }
 0xb8e   :  { %v1472_v0 = vmul.f32 %v3645_v62, %v1458_v26 }
 0xb8f   :  { %v3647_v1 = vpop.eup %3646 }
 0xb90   :  { %v1473_v2 = vmul.f32 %v3647_v1, %v1459_v28  ;;  %v1480_v3 = vmul.f32 %v2992_v63, %v1472_v0 }
 0xb92   :  { %v1481_v14 = vmul.f32 %v2992_v63, %v1473_v2  ;;  %v1488_v6 = vadd.f32 %v2993_v5, %v1480_v3 }
 0xb94   :  { %v1489_v7 = vadd.f32 %v2993_v5, %v1481_v14 }
 0xb96   :  { %v4180_v8 = vpack.c.bf16 %v1489_v7, %v1488_v6 }
 0xb98   :  { %1703 = vmatmul.mubr.bf16.vlgmr.msra.gmra.mrb[28].mxu1 %v4180_v8  ;;  %3316 = vmatmul.mubr.bf16.vlgmr.msra.gmra.mrb[24].mxu0 %v4180_v8 }
 0xb99   :  { %3321 = vmatprep.mubr.msk.bf16.mxu1 %vm3803_vm0, %v3801_v4  ;;  %3345 = vmatprep.mubr.msk.bf16.mxu0 %vm3803_vm0, %v3801_v4 }
 0xc6b   :  { %v1704_v12 = vpop.f32.mrb[28].mxu1  ;;  %v1747_v13 = vpop.f32.mrb[24].mxu0 }
 0xc6c   :  { %v1706_v16 = vpop.f32.mrb[29].mxu1  ;;  %v3317_v17 = vpop.f32.mrb[25].mxu0  ;;  %v1705_v19 = vadd.f32 %v1704_v12, %v1530_v10  ;;  %v1748_v20 = vadd.f32 %v1747_v13, %v1538_v11 }
 0xc6d   :  { %v1708_v52 = vpop.f32.mrb[30].mxu1  ;;  %v1750_v18 = vpop.f32.mrb[26].mxu0  ;;  %v1707_v24 = vadd.f32 %v1706_v16, %v1534_v15 }
 0xc6e   :  { %v1709_v21 = vadd.f32 %v1708_v52, %v1530_v10  ;;  %v1751_v22 = vadd.f32 %v1750_v18, %v1538_v11  ;;  %v1710_v23 = vpop.f32.mrb[31].mxu1  ;;  %v3318_v60 = vpop.f32.mrb[27].mxu0 }
 0xc6f   :  { %v1711_v25 = vadd.f32 %v1710_v23, %v1534_v15 }
 0xc70   :  { %v1754_v26 = vpack.c.bf16 %v1709_v21, %v1705_v19  ;;  %v4195_v27 = vpack.c.bf16 %v1751_v22, %v1748_v20 }
 0xc71   :  { %v1755_v54 = vpack.c.bf16 %v1711_v25, %v1707_v24 }
 0xc73   :  { %v1761_v56 = vsel %vm409_vm1, %v1755_v54, 0 }
 0xc74   :  { %3320 = vmatpush3.bf16.xpose.msra.mxu1 %v1761_v56 }
 0xc75   :  { %3325 = vmatprep.subr.bf16.mxu1 %v3801_v4 }
 0xc7b   :  { %3322 = vmatmul.mubr.msk.bf16.vlgmr.msra.gmra.mrb[32].mxu1 %vm409_vm1, %v1754_v26 }
 0xc7c   :  { %3326 = vmatpush3.bf16.msra.mxu1 %v4195_v27  ;;  %3327 = vmatprep.mubr.msk.bf16.mxu1 %vm3803_vm0, %v3801_v4 }
 0xc7d   :  { %3331 = vmatprep.subr.bf16.mxu1 %v3801_v4 }
 0xd4e   :  { %v1797_v28 = vpop.f32.mrb[32].mxu1 }
 0xd4f   :  { %v1798_v30 = vadd.f32 %v4207_v29, %v1797_v28  ;;  %v3323_v31 = vpop.f32.mrb[33].mxu1 }
 0xd50   :  { %v1800_v32 = vpop.f32.mrb[34].mxu1 }
 0xd51   :  { %v1801_v34 = vadd.f32 %v4213_v33, %v1800_v32  ;;  %v3324_v36 = vpop.f32.mrb[35].mxu1  ;;  %v1804_v37 = vsel %vm457_vm2, %v1798_v30, -inf }
 0xd52   :  { %1805 = vmax.xlane.f32.xlu0 %v1804_v37 }
 0xd53   :  { %v1807_v38 = vsel %vm457_vm2, %v1801_v34, -inf }
 0xd54   :  { %1808 = vmax.xlane.f32.xlu1 %v1807_v38 }
 0xddf   :  { %v1806_v39 = vpop.xlane.xlu0 %1805 }
 0xde0   :  { %v1810_v40 = vsub.f32 %v1798_v30, %v1806_v39 }
 0xde1   :  { %v1809_v41 = vpop.xlane.xlu1 %1808 }
 0xde2   :  { %v1812_v42 = vmul.f32 1.442695, %v1810_v40  ;;  %v1811_v43 = vsub.f32 %v1801_v34, %v1809_v41 }
 0xde4   :  { %3648 = vpow2.f32 %v1812_v42  ;;  %v1814_v44 = vmul.f32 1.442695, %v1811_v43 }
 0xde6   :  { %3650 = vpow2.f32 %v1814_v44 }
 0xdee   :  { %v3649_v45 = vpop.eup %3648 }
 0xdef   :  { %v1816_v46 = vsel %vm457_vm2, %v3649_v45, 0.0 }
 0xdf0   :  { %v3651_v47 = vpop.eup %3650  ;;  %1817 = vadd.xlane.f32.xlu0 %v1816_v46 }
 0xdf1   :  { %v1819_v48 = vsel %vm457_vm2, %v3651_v47, 0.0 }
 0xdf2   :  { %1820 = vadd.xlane.f32.xlu1 %v1819_v48 }
 0xe03   :  { %1872 = vrot.lane.b32.xlu1 %v1754_v26, %s3804_s28 }
 0xe06   :  { %1875 = vrot.lane.b32.xlu0 %v1755_v54, %s3804_s28 }
 0xe07   :  { %1997 = vrot.lane.b32.xlu1 %v1755_v54, %s4421_s5 }
 0xe0a   :  { %2118 = vrot.lane.b32.xlu0 %v1755_v54, %s3805_s29 }
 0xe0b   :  { %1995 = vrot.lane.b32.xlu1 %v1754_v26, %s4421_s5 }
 0xe0f   :  { %2116 = vrot.lane.b32.xlu1 %v1754_v26, %s3805_s29 }
 0xe7d   :  { %v1818_v49 = vpop.xlane.xlu0 %1817 }
 0xe7e   :  { %3652 = vrcp.f32 %v1818_v49 }
 0xe7f   :  { %v1821_v50 = vpop.xlane.xlu1 %1820 }
 0xe80   :  { %3654 = vrcp.f32 %v1821_v50 }
 0xe81   :  { %v1876_v53 = vpop.permute.xlu0 %1875 }
 0xe82   :  { %v1881_v3 = vsel %vm409_vm1, %v1876_v53, 0 }
 0xe83   :  { %v1873_v51 = vpop.permute.xlu1 %1872 }
 0xe85   :  { %v2119_v1 = vpop.permute.xlu0 %2118 }
 0xe86   :  { %v2124_v14 = vsel %vm409_vm1, %v2119_v1, 0 }
 0xe87   :  { %v1998_v57 = vpop.permute.xlu1 %1997 }
 0xe88   :  { %v3653_v59 = vpop.eup %3652  ;;  %v2003_v61 = vsel %vm409_vm1, %v1998_v57, 0 }
 0xe89   :  { %3344 = vmatpush3.bf16.xpose.msra.mxu0 %v2003_v61  ;;  %v1824_v63 = vmul.f32 %v3653_v59, %v3649_v45 }
 0xe8a   :  { %v3655_v62 = vpop.eup %3654  ;;  %3355 = vmatprep.subr.bf16.mxu0 %v3801_v4 }
 0xe8b   :  { %v1825_v0 = vmul.f32 %v3655_v62, %v3651_v47  ;;  %v1996_v5 = vpop.permute.xlu1 %1995 }
 0xe8d   :  { %v1826_v2 = vpack.c.bf16 %v1825_v0, %v1824_v63 }
 0xe8f   :  { %3328 = vmatmul.mubr.msk.bf16.vlgmr.msra.gmra.mrb[36].mxu1 %vm457_vm2, %v1826_v2  ;;  %v2117_v6 = vpop.permute.xlu1 %2116 }
 0xe90   :  { %3332 = vmatpush3.bf16.xpose.msra.mxu1 %v1881_v3  ;;  %3346 = vmatmul.mubr.msk.bf16.vlgmr.msra.gmra.mrb[28].mxu0 %vm409_vm1, %v1996_v5 }
 0xe91   :  { %3356 = vmatpush3.bf16.xpose.msra.mxu0 %v2124_v14  ;;  %3333 = vmatprep.mubr.msk.bf16.mxu1 %vm3803_vm0, %v3801_v4 }
 0xe92   :  { %3357 = vmatprep.mubr.msk.bf16.mxu0 %vm3803_vm0, %v3801_v4  ;;  %3337 = vmatprep.subr.bf16.mxu1 %v3801_v4 }
 0xe93   :  { %3367 = vmatprep.subr.bf16.mxu0 %v3801_v4 }
 0xe97   :  { %3334 = vmatmul.mubr.msk.bf16.vlgmr.msra.gmra.mrb[40].mxu1 %vm409_vm1, %v1873_v51 }
 0xe98   :  { %3358 = vmatmul.mubr.msk.bf16.vlgmr.msra.gmra.mrb[32].mxu0 %vm409_vm1, %v2117_v6  ;;  %3339 = vmatprep.mubr.msk.bf16.mxu1 %vm3803_vm0, %v3801_v4 }
 0xe99   :  { %3383 = vmatprep.mubr.msk.bf16.mxu0 %vm3803_vm0, %v3801_v4 }
 0xf62   :  { %v4244_v7 = vpop.f32.mrb[36].mxu1 }
 0xf63   :  { %v3329_v9 = vpop.f32.mrb[37].mxu1  ;;  %v2039_v10 = vpop.f32.mrb[28].mxu0 }
 0xf64   :  { %v4246_v11 = vpop.f32.mrb[38].mxu1  ;;  %v3347_v12 = vpop.f32.mrb[29].mxu0  ;;  %v2040_v22 = vadd.f32 %v4207_v29, %v2039_v10 }
 0xf65   :  { %v3330_v13 = vpop.f32.mrb[39].mxu1  ;;  %v2042_v15 = vpop.f32.mrb[30].mxu0 }
 0xf66   :  { %v3348_v16 = vpop.f32.mrb[31].mxu0  ;;  %v2043_v28 = vadd.f32 %v4213_v33, %v2042_v15  ;;  %v2046_v30 = vsel %vm457_vm2, %v2040_v22, -inf }
 0xf68   :  { %v2049_v34 = vsel %vm457_vm2, %v2043_v28, -inf }
 0xf6a   :  { %v1917_v17 = vpop.f32.mrb[40].mxu1 }
 0xf6b   :  { %v1918_v52 = vadd.f32 %v4207_v29, %v1917_v17  ;;  %v3335_v18 = vpop.f32.mrb[41].mxu1  ;;  %v2160_v19 = vpop.f32.mrb[32].mxu0 }
 0xf6c   :  { %v1920_v20 = vpop.f32.mrb[42].mxu1  ;;  %v3359_v21 = vpop.f32.mrb[33].mxu0  ;;  %v2161_v32 = vadd.f32 %v4207_v29, %v2160_v19 }
 0xf6d   :  { %v1921_v23 = vadd.f32 %v4213_v33, %v1920_v20  ;;  %v3336_v60 = vpop.f32.mrb[43].mxu1  ;;  %v2163_v24 = vpop.f32.mrb[34].mxu0  ;;  %v1924_v25 = vsel %vm457_vm2, %v1918_v52, -inf }
 0xf6e   :  { %v3360_v26 = vpop.f32.mrb[35].mxu0  ;;  %1925 = vmax.xlane.f32.xlu0 %v1924_v25  ;;  %v2164_v54 = vadd.f32 %v4213_v33, %v2163_v24  ;;  %v2167_v36 = vsel %vm457_vm2, %v2161_v32, -inf }
 0xf6f   :  { %v1927_v56 = vsel %vm457_vm2, %v1921_v23, -inf }
 0xf70   :  { %1928 = vmax.xlane.f32.xlu1 %v1927_v56  ;;  %v2170_v31 = vsel %vm457_vm2, %v2164_v54, -inf }
 0xf72   :  { %2047 = vmax.xlane.f32.xlu0 %v2046_v30 }
 0xf74   :  { %2171 = vmax.xlane.f32.xlu1 %v2170_v31 }
 0xf76   :  { %2050 = vmax.xlane.f32.xlu0 %v2049_v34  ;;  %v3549_v34 = vld [vmem:[#allocation5 + $0x48] sm:$0xff]  }
 0xf7a   :  { %2168 = vmax.xlane.f32.xlu0 %v2167_v36  ;;  %v3550_v36 = vld [vmem:[#allocation5 + $0x50] sm:$0xff]  }
 0xffb   :  { %v1926_v37 = vpop.xlane.xlu0 %1925 }
 0xffc   :  { %v1930_v45 = vsub.f32 %v1918_v52, %v1926_v37  ;;  %v3551_v37 = vld [vmem:[#allocation5 + $0x58] sm:$0xff]  }
 0xffd   :  { %v1929_v38 = vpop.xlane.xlu1 %1928 }
 0xffe   :  { %v1931_v46 = vsub.f32 %v1921_v23, %v1929_v38  ;;  %v1932_v50 = vmul.f32 1.442695, %v1930_v45  ;;  %v3552_v38 = vld [vmem:[#allocation5 + $0x60] sm:$0xff]  }
 0xfff   :  { %v2048_v39 = vpop.xlane.xlu0 %2047 }
0x1000   :  { %v2052_v40 = vsub.f32 %v2040_v22, %v2048_v39  ;;  %v1934_v51 = vmul.f32 1.442695, %v1931_v46  ;;  %v3555_v46 = vld [vmem:[#allocation5 + $0x78] sm:$0xff]  }
0x1001   :  { %v2172_v41 = vpop.xlane.xlu1 %2171 }
0x1002   :  { %v2054_v33 = vmul.f32 1.442695, %v2052_v40  ;;  %v2174_v42 = vsub.f32 %v2164_v54, %v2172_v41  ;;  %v3553_v40 = vld [vmem:[#allocation5 + $0x68] sm:$0xff]  }
0x1003   :  { %v2051_v43 = vpop.xlane.xlu0 %2050 }
0x1004   :  { %3656 = vpow2.f32 %v2054_v33  ;;  %v2053_v44 = vsub.f32 %v2043_v28, %v2051_v43  ;;  %v2177_v47 = vmul.f32 1.442695, %v2174_v42  ;;  %v3554_v43 = vld [vmem:[#allocation5 + $0x70] sm:$0xff]  }
0x1006   :  { %v2056_v29 = vmul.f32 1.442695, %v2053_v44 }
0x1007   :  { %v2169_v48 = vpop.xlane.xlu0 %2168 }
0x1008   :  { %3658 = vpow2.f32 %v2056_v29  ;;  %v2173_v49 = vsub.f32 %v2161_v32, %v2169_v48  ;;  %v3548_v32 = vld [vmem:[#allocation5 + $0x40] sm:$0xff]  }
0x1009   :  { %3660 = vpow2.f32 %v2177_v47  ;;  %3368 = vmatpush3.bf16.msra.mxu0 %v3548_v32 }
0x100a   :  { %v2175_v53 = vmul.f32 1.442695, %v2173_v49  ;;  %3369 = vmatprep.subr.bf16.mxu0 %v3801_v4 }
0x100c   :  { %3662 = vpow2.f32 %v2175_v53 }
0x100d   :  { %3664 = vpow2.f32 %v1932_v50  ;;  %3370 = vmatpush3.bf16.msra.mxu0 %v3549_v34  ;;  %v3564_v34 = vld [vmem:[%s4408_s11 + $0xa4] ss:$8 sps:$4 sm:$0xff]  }
0x100e   :  { %v3657_v57 = vpop.eup %3656  ;;  %3666 = vpow2.f32 %v1934_v51  ;;  %3371 = vmatprep.subr.bf16.mxu0 %v3801_v4 }
0x100f   :  { %v2058_v59 = vsel %vm457_vm2, %v3657_v57, 0.0 }
0x1010   :  { %2059 = vadd.xlane.f32.xlu0 %v2058_v59 }
0x1011   :  { %3372 = vmatpush3.bf16.msra.mxu0 %v3550_v36  ;;  %v3562_v36 = vld [vmem:[%s4408_s11 + $0xa0] ss:$8 sps:$4 sm:$0xff]  }
0x1012   :  { %v3659_v61 = vpop.eup %3658  ;;  %3373 = vmatprep.subr.bf16.mxu0 %v3801_v4 }
0x1013   :  { %v2061_v62 = vsel %vm457_vm2, %v3659_v61, 0.0  ;;  %v3661_v63 = vpop.eup %3660 }
0x1014   :  { %2062 = vadd.xlane.f32.xlu1 %v2061_v62  ;;  %v2182_v3 = vsel %vm457_vm2, %v3661_v63, 0.0 }
0x1015   :  { %3374 = vmatpush3.bf16.msra.mxu0 %v3551_v37  ;;  %v3567_v37 = vld [vmem:[%s4408_s11 + $0xb4] ss:$8 sps:$4 sm:$0xff]  }
0x1016   :  { %v3663_v0 = vpop.eup %3662  ;;  %3375 = vmatprep.subr.bf16.mxu0 %v3801_v4 }
0x1017   :  { %v3665_v1 = vpop.eup %3664  ;;  %v2179_v2 = vsel %vm457_vm2, %v3663_v0, 0.0 }
0x1018   :  { %v3667_v5 = vpop.eup %3666  ;;  %2180 = vadd.xlane.f32.xlu0 %v2179_v2  ;;  %2183 = vadd.xlane.f32.xlu1 %v2182_v3  ;;  %v1936_v14 = vsel %vm457_vm2, %v3665_v1, 0.0 }
0x1019   :  { %v1939_v6 = vsel %vm457_vm2, %v3667_v5, 0.0  ;;  %3376 = vmatpush3.bf16.msra.mxu0 %v3552_v38  ;;  %v3565_v38 = vld [vmem:[%s4408_s11 + $0xb0] ss:$8 sps:$4 sm:$0xff]  }
0x101a   :  { %3377 = vmatprep.subr.bf16.mxu0 %v3801_v4 }
0x101c   :  { %1937 = vadd.xlane.f32.xlu0 %v1936_v14  ;;  %1940 = vadd.xlane.f32.xlu1 %v1939_v6 }
0x101d   :  { %3378 = vmatpush3.bf16.msra.mxu0 %v3553_v40  ;;  %v3573_v40 = vld [vmem:[%s4408_s11 + $0xd4] ss:$8 sps:$4 sm:$0xff]  }
0x101e   :  { %3379 = vmatprep.subr.bf16.mxu0 %v3801_v4 }
0x1021   :  { %3380 = vmatpush3.bf16.msra.mxu0 %v3554_v43  ;;  %v3579_v43 = vld [vmem:[%s4408_s11 + $0xf4] ss:$8 sps:$4 sm:$0xff]  }
0x1022   :  { %3381 = vmatprep.subr.bf16.mxu0 %v3801_v4 }
0x1025   :  { %3382 = vmatpush3.bf16.msra.mxu0 %v3555_v46 }
0x102d   :  { %2069 = vrot.lane.b32.xlu1 %v4195_v27, %s4421_s5 }
0x1031   :  { %2190 = vrot.lane.b32.xlu1 %v4195_v27, %s3805_s29 }
0x1032   :  { %1948 = vrot.lane.b32.xlu0 %v4195_v27, %s3804_s28 }
0x109d   :  { %v2060_v9 = vpop.xlane.xlu0 %2059 }
0x10a1   :  { %v2063_v10 = vpop.xlane.xlu1 %2062 }
0x10a5   :  { %v2181_v12 = vpop.xlane.xlu0 %2180  ;;  %v2184_v13 = vpop.xlane.xlu1 %2183 }
0x10a9   :  { %v1938_v15 = vpop.xlane.xlu0 %1937  ;;  %v1941_v16 = vpop.xlane.xlu1 %1940 }
0x10aa   :  { %3668 = vrcp.f32 %v1938_v15 }
0x10ab   :  { %3670 = vrcp.f32 %v1941_v16  ;;  %v3028_v16 = vld [vmem:[%s4405_s8 + $0x1] ss:$0 sm:$0xff] }
0x10ac   :  { %3672 = vrcp.f32 %v2063_v10 }
0x10ad   :  { %v1949_v17 = vpop.permute.xlu0 %1948  ;;  %3674 = vrcp.f32 %v2060_v9  ;;  %v2070_v22 = vpop.permute.xlu1 %2069 }
0x10ae   :  { %3338 = vmatpush3.bf16.msra.mxu1 %v1949_v17  ;;  %3676 = vrcp.f32 %v2181_v12 }
0x10af   :  { %3349 = vmatprep.subr.bf16.mxu1 %v3801_v4  ;;  %3678 = vrcp.f32 %v2184_v13 }
0x10b1   :  { %v2191_v56 = vpop.permute.xlu1 %2190 }
0x10b4   :  { %v3669_v52 = vpop.eup %3668 }
0x10b5   :  { %v3671_v18 = vpop.eup %3670  ;;  %v1944_v19 = vmul.f32 %v3669_v52, %v3665_v1 }
0x10b6   :  { %v1945_v20 = vmul.f32 %v3671_v18, %v3667_v5  ;;  %v3673_v21 = vpop.eup %3672 }
0x10b7   :  { %v3675_v23 = vpop.eup %3674  ;;  %v2067_v60 = vmul.f32 %v3673_v21, %v3659_v61  ;;  %v2383_v21 = vunpack.c.h.bf16 %v4180_v8 }
0x10b8   :  { %v1946_v27 = vpack.c.bf16 %v1945_v20, %v1944_v19  ;;  %v2066_v24 = vmul.f32 %v3675_v23, %v3657_v57  ;;  %v3677_v25 = vpop.eup %3676  ;;  %v3556_v23 = vld [vmem:[%s4408_s11 + $0x80] ss:$8 sps:$4 sm:$0xff]  }
0x10b9   :  { %v3679_v54 = vpop.eup %3678  ;;  %v2187_v28 = vmul.f32 %v3677_v25, %v3663_v0 }
0x10ba   :  { %3340 = vmatmul.mubr.msk.bf16.vlgmr.msra.gmra.mrb[44].mxu1 %vm457_vm2, %v1946_v27  ;;  %v2068_v26 = vpack.c.bf16 %v2067_v60, %v2066_v24  ;;  %v2188_v30 = vmul.f32 %v3679_v54, %v3661_v63  ;;  %v3558_v60 = vld [vmem:[%s4408_s11 + $0x84] ss:$8 sps:$4 sm:$0xff]   ;;  %v3561_v24 = vld [vmem:[%s4408_s11 + $0x94] ss:$8 sps:$4 sm:$0xff]  }
0x10bb   :  { %3350 = vmatpush3.bf16.msra.mxu1 %v2070_v22  ;;  %3351 = vmatprep.mubr.msk.bf16.mxu1 %vm3803_vm0, %v3801_v4 }
0x10bc   :  { %3361 = vmatprep.subr.bf16.mxu1 %v3801_v4  ;;  %v2189_v31 = vpack.c.bf16 %v2188_v30, %v2187_v28 }
0x10c2   :  { %3352 = vmatmul.mubr.msk.bf16.vlgmr.msra.gmra.mrb[48].mxu1 %vm457_vm2, %v2068_v26 }
0x10c3   :  { %3362 = vmatpush3.bf16.msra.mxu1 %v2191_v56  ;;  %3363 = vmatprep.mubr.msk.bf16.mxu1 %vm3803_vm0, %v3801_v4 }
0x10c4   :  { %2539 = vmatprep.subr.bf16.mxu1 %v3558_v60 }
0x10ca   :  { %3364 = vmatmul.mubr.msk.bf16.vlgmr.msra.gmra.mrb[52].mxu1 %vm457_vm2, %v2189_v31 }
0x10cb   :  { %2571 = vmatprep.mubr.bf16.mxu1 %v3802_v35  ;;  %2540 = vmatpush1.bf16.msra.mxu1 %v3556_v23 }
0x10cc   :  { %2541 = vmatprep.subr.bf16.mxu1 %v3561_v24 }
0x118d   :  { %v1988_v39 = vpop.f32.mrb[44].mxu1 }
0x118e   :  { %v3341_v35 = vpop.f32.mrb[45].mxu1 }
0x118f   :  { %v1991_v41 = vpop.f32.mrb[46].mxu1  ;;  %v3568_v35 = vld [vmem:[%s4408_s11 + $0xc0] ss:$8 sps:$4 sm:$0xff]  }
0x1190   :  { %v3421_v33 = vpack.i.bf16 %v1991_v41, %v1988_v39  ;;  %v3342_v42 = vpop.f32.mrb[47].mxu1  ;;  %v3570_v39 = vld [vmem:[%s4408_s11 + $0xc4] ss:$8 sps:$4 sm:$0xff]   ;;  %v3571_v41 = vld [vmem:[%s4408_s11 + $0xd0] ss:$8 sps:$4 sm:$0xff]  }
0x1191   :  { %v3574_v42 = vld [vmem:[%s4408_s11 + $0xe0] ss:$8 sps:$4 sm:$0xff]  }
0x1192   :  { %3422 = vrot.lane.b32.xlu1 %v3421_v33, %s3805_s29  ;;  %v3576_v33 = vld [vmem:[%s4408_s11 + $0xe4] ss:$8 sps:$4 sm:$0xff]  }
0x1195   :  { %v2109_v44 = vpop.f32.mrb[48].mxu1 }
0x1196   :  { %v3353_v45 = vpop.f32.mrb[49].mxu1 }
0x1197   :  { %v2112_v47 = vpop.f32.mrb[50].mxu1 }
0x1198   :  { %v3426_v29 = vpack.i.bf16 %v2112_v47, %v2109_v44  ;;  %v3354_v48 = vpop.f32.mrb[51].mxu1  ;;  %v3577_v44 = vld [vmem:[%s4408_s11 + $0xf0] ss:$8 sps:$4 sm:$0xff]  }
0x119a   :  { %3427 = vrot.lane.b32.xlu0 %v3426_v29, %s4421_s5 }
0x119d   :  { %v2230_v49 = vpop.f32.mrb[52].mxu1 }
0x119e   :  { %v3365_v50 = vpop.f32.mrb[53].mxu1 }
0x119f   :  { %v2233_v51 = vpop.f32.mrb[54].mxu1 }
0x11a0   :  { %v3431_v53 = vpack.i.bf16 %v2233_v51, %v2230_v49  ;;  %v3366_v57 = vpop.f32.mrb[55].mxu1 }
0x11a2   :  { %3432 = vrot.lane.b32.xlu1 %v3431_v53, %s3804_s28  ;;  %v3039_v53 = vld [vmem:[%s4406_s9 + $0x1] ss:$0 sm:$0xff] }
0x1204   :  { %v3423_v59 = vpop.permute.xlu1 %3422 }
0x1205   :  { %v3425_v62 = vunpack.i.h.bf16 %v3423_v59  ;;  %v3424_v63 = vunpack.i.l.bf16 %v3423_v59 }
0x1207   :  { %v2262_v3 = vsel %vm409_vm1, %v4246_v11, %v3425_v62  ;;  %v2261_v5 = vsel %vm409_vm1, %v4244_v7, %v3424_v63  ;;  %v2382_v7 = vunpack.c.l.bf16 %v4180_v8  ;;  %v3559_v8 = vld [vmem:[%s4408_s11 + $0x90] ss:$8 sps:$4 sm:$0xff]   ;;  %v3040_v62 = vld [vmem:[%s4407_s10 + $0x1] ss:$0 sm:$0xff] }
0x1208   :  { %2542 = vmatpush1.bf16.msra.mxu1 %v3559_v8 }
0x1209   :  { %2543 = vmatprep.subr.bf16.mxu1 %v3564_v34 }
0x120c   :  { %v3428_v61 = vpop.permute.xlu0 %3427  ;;  %2544 = vmatpush1.bf16.msra.mxu1 %v3562_v36 }
0x120d   :  { %v3430_v0 = vunpack.i.h.bf16 %v3428_v61  ;;  %v3429_v1 = vunpack.i.l.bf16 %v3428_v61  ;;  %2545 = vmatprep.subr.bf16.mxu1 %v3567_v37 }
0x120f   :  { %v2264_v9 = vsel %vm917_vm3, %v2262_v3, %v3430_v0  ;;  %v2263_v10 = vsel %vm917_vm3, %v2261_v5, %v3429_v1  ;;  %v3580_v3 = vld [vmem:[#allocation7 + $0xc0] sm:$0xff]  }
0x1210   :  { %2546 = vmatpush1.bf16.msra.mxu1 %v3565_v38  ;;  %v3581_v5 = vld [vmem:[#allocation7 + $0x80] sm:$0xff]   ;;  %3187 = vmatprep.subr.bf16.mxu0 %v3580_v3 }
0x1211   :  { %2547 = vmatprep.subr.bf16.mxu1 %v3570_v39 }
0x1214   :  { %v3433_v2 = vpop.permute.xlu1 %3432  ;;  %2548 = vmatpush1.bf16.msra.mxu1 %v3568_v35 }
0x1215   :  { %v3435_v14 = vunpack.i.h.bf16 %v3433_v2  ;;  %v3434_v6 = vunpack.i.l.bf16 %v3433_v2  ;;  %2549 = vmatprep.subr.bf16.mxu1 %v3573_v40 }
0x1217   :  { %v2266_v12 = vsel %vm920_vm4, %v2264_v9, %v3435_v14  ;;  %v2265_v13 = vsel %vm920_vm4, %v2263_v10, %v3434_v6  ;;  %v3582_v14 = vld [vmem:[#allocation7 + $0xc8] sm:$0xff]   ;;  %v3584_v9 = vld [vmem:[#allocation7 + $0xd0] sm:$0xff]  }
0x1218   :  { %v2267_v15 = vpack.c.bf16 %v2266_v12, %v2265_v13  ;;  %2550 = vmatpush1.bf16.msra.mxu1 %v3571_v41  ;;  %v3583_v6 = vld [vmem:[#allocation7 + $0x88] sm:$0xff]   ;;  %v3585_v10 = vld [vmem:[#allocation7 + $0x90] sm:$0xff]   ;;  %v3586_v12 = vld [vmem:[#allocation7 + $0xd8] sm:$0xff]  }
0x1219   :  { %2551 = vmatprep.subr.bf16.mxu1 %v3576_v33  ;;  %v3587_v13 = vld [vmem:[#allocation7 + $0x98] sm:$0xff]  }
0x121a   :  { %3384 = vmatmul.mubr.bf16.vlgmr.msra.gmra.mrb[36].mxu0 %v2267_v15  ;;  %v3588_v15 = vld [vmem:[#allocation7 + $0xe0] sm:$0xff]  }
0x121b   :  { %3188 = vmatpush3.bf16.msra.mxu0 %v3581_v5 }
0x121c   :  { %2552 = vmatpush1.bf16.msra.mxu1 %v3574_v42  ;;  %3189 = vmatprep.subr.bf16.mxu0 %v3582_v14 }
0x121d   :  { %2553 = vmatprep.subr.bf16.mxu1 %v3579_v43 }
0x121f   :  { %3190 = vmatpush3.bf16.msra.mxu0 %v3583_v6  ;;  %v3075_v6 = vld [vmem:[%s4411_s14 + $0x1] ss:$0 sm:$0xff] }
0x1220   :  { %2554 = vmatpush1.bf16.msra.mxu1 %v3577_v44  ;;  %3191 = vmatprep.subr.bf16.mxu0 %v3584_v9 }
0x1221   :  { %3387 = vmatprep.subr.bf16.mxu1 %v3801_v4 }
0x1223   :  { %3192 = vmatpush3.bf16.msra.mxu0 %v3585_v10 }
0x1224   :  { %3193 = vmatprep.subr.bf16.mxu0 %v3586_v12 }
0x1227   :  { %3194 = vmatpush3.bf16.msra.mxu0 %v3587_v13 }
0x1228   :  { %3195 = vmatprep.subr.bf16.mxu0 %v3588_v15 }
0x12ed   :  { %v2375_v11 = vpop.f32.mrb[36].mxu0 }
0x12ee   :  { %v2376_v17 = vadd.f32 %v3028_v16, %v2375_v11  ;;  %v3385_v52 = vpop.f32.mrb[37].mxu0  ;;  %v3591_v11 = vld [vmem:[#allocation7 + $0xa8] sm:$0xff]  }
0x12ef   :  { %v2378_v18 = vpop.f32.mrb[38].mxu0  ;;  %v3593_v52 = vld [vmem:[#allocation7 + $0xb0] sm:$0xff]  }
0x12f0   :  { %v2379_v19 = vadd.f32 %v3028_v16, %v2378_v18  ;;  %v3386_v20 = vpop.f32.mrb[39].mxu0  ;;  %v2384_v27 = vadd.f32 %v2382_v7, %v2376_v17  ;;  %v3589_v16 = vld [vmem:[#allocation7 + $0xa0] sm:$0xff]   ;;  %v3592_v17 = vld [vmem:[#allocation7 + $0xf0] sm:$0xff]   ;;  %v3594_v7 = vld [vmem:[#allocation7 + $0xf8] sm:$0xff]  }
0x12f1   :  { %3196 = vmatpush3.bf16.msra.mxu0 %v3589_v16  ;;  %v3595_v18 = vld [vmem:[#allocation7 + $0xb8] sm:$0xff]  }
0x12f2   :  { %2390 = vadd.xlane.f32.xlu0 %v2384_v27  ;;  %v2385_v22 = vadd.f32 %v2383_v21, %v2379_v19  ;;  %v3057_v19 = vld [vmem:[%s4409_s12 + $0x2] sm:$0x3] }
0x12f3   :  { %v2452_v20 = vrot.slane %v3057_v19, %v3985_v55 }
0x12f4   :  { %2392 = vadd.xlane.f32.xlu1 %v2385_v22 }
0x137f   :  { %v2391_v25 = vpop.xlane.xlu0 %2390 }
0x1380   :  { %v2394_v26 = vmul.f32 0.0078125, %v2391_v25 }
0x1381   :  { %v2393_v54 = vpop.xlane.xlu1 %2392 }
0x1382   :  { %v2396_v56 = vsub.f32 %v2384_v27, %v2394_v26  ;;  %v2395_v28 = vmul.f32 0.0078125, %v2393_v54  ;;  %v2456_v27 = vrot.slane %v3057_v19, %v3992_v58 }
0x1384   :  { %v2397_v30 = vsub.f32 %v2385_v22, %v2395_v28  ;;  %v2398_v31 = vmul.f32 %v2396_v56, %v2396_v56 }
0x1386   :  { %2400 = vadd.xlane.f32.xlu0 %v2398_v31  ;;  %v2399_v32 = vmul.f32 %v2397_v30, %v2397_v30 }
0x138a   :  { %2402 = vadd.xlane.f32.xlu0 %v2399_v32 }
0x1413   :  { %v2401_v45 = vpop.xlane.xlu0 %2400 }
0x1414   :  { %v2404_v46 = vmul.f32 0.0078125, %v2401_v45 }
0x1416   :  { %v2406_v47 = vadd.f32 1e-12, %v2404_v46 }
0x1417   :  { %v2403_v29 = vpop.xlane.xlu0 %2402 }
0x1418   :  { %3680 = vrsqrt.f32 %v2406_v47  ;;  %v2405_v48 = vmul.f32 0.0078125, %v2403_v29 }
0x141a   :  { %v2407_v49 = vadd.f32 1e-12, %v2405_v48 }
0x141c   :  { %3682 = vrsqrt.f32 %v2407_v49 }
0x1422   :  { %v3681_v50 = vpop.eup %3680 }
0x1423   :  { %v2410_v51 = vmul.f32 %v3681_v50, %v2396_v56 }
0x1425   :  { %v2418_v61 = vmul.f32 %v3039_v53, %v2410_v51 }
0x1426   :  { %v3683_v57 = vpop.eup %3682 }
0x1427   :  { %v2411_v59 = vmul.f32 %v3683_v57, %v2397_v30  ;;  %v2426_v0 = vadd.f32 %v3040_v62, %v2418_v61 }
0x1429   :  { %v2419_v63 = vmul.f32 %v3039_v53, %v2411_v59 }
0x142b   :  { %v2427_v1 = vadd.f32 %v3040_v62, %v2419_v63 }
0x142d   :  { %v4360_v2 = vpack.c.bf16 %v2427_v1, %v2426_v0 }
0x142f   :  { %2572 = vmatmul.mubr.bf16.vlgmr.msra.gmra.mrb[56].mxu1 %v4360_v2 }
0x1430   :  { %3389 = vmatprep.mubr.msk.bf16.mxu1 %vm3803_vm0, %v3801_v4  ;;  %v3590_v4 = vld [vmem:[#allocation7 + $0xe8] sm:$0xff]  }
0x1431   :  { %3197 = vmatprep.subr.bf16.mxu0 %v3590_v4  ;;  %v2798_v4 = vunpack.c.l.bf16 %v4360_v2 }
0x1432   :  { %3198 = vmatpush3.bf16.msra.mxu0 %v3591_v11 }
0x1433   :  { %3199 = vmatprep.subr.bf16.mxu0 %v3592_v17 }
0x1436   :  { %3200 = vmatpush3.bf16.msra.mxu0 %v3593_v52  ;;  %v2799_v52 = vunpack.c.h.bf16 %v4360_v2 }
0x1437   :  { %3201 = vmatprep.subr.bf16.mxu0 %v3594_v7 }
0x143a   :  { %3202 = vmatpush3.bf16.msra.mxu0 %v3595_v18 }
0x1502   :  { %v2573_v21 = vpop.f32.mrb[56].mxu1 }
0x1503   :  { %v2574_v22 = vadd.f32 %v2573_v21, %v2452_v20  ;;  %v2575_v23 = vpop.f32.mrb[57].mxu1 }
0x1504   :  { %v2576_v60 = vadd.f32 %v2575_v23, %v2456_v27  ;;  %v2577_v24 = vpop.f32.mrb[58].mxu1 }
0x1505   :  { %v2582_v8 = vmul.f32 %v2574_v22, %v2574_v22  ;;  %v2578_v25 = vadd.f32 %v2577_v24, %v2452_v20  ;;  %v2579_v26 = vpop.f32.mrb[59].mxu1  ;;  %v2845_v24 = vld [vmem:[%s4399_s2] sm:$0x3] }
0x1506   :  { %v2583_v54 = vmul.f32 %v2576_v60, %v2576_v60  ;;  %v2580_v56 = vadd.f32 %v2579_v26, %v2456_v27 }
0x1507   :  { %v2586_v28 = vmul.f32 %v2582_v8, %v2574_v22  ;;  %v2584_v30 = vmul.f32 %v2578_v25, %v2578_v25  ;;  %v2891_v8 = vsel %vm2890_vm5, %v2845_v24, 0.0 }
0x1508   :  { %v2587_v31 = vmul.f32 %v2583_v54, %v2576_v60  ;;  %v2585_v32 = vmul.f32 %v2580_v56, %v2580_v56 }
0x1509   :  { %v2590_v34 = vmul.f32 0.044715, %v2586_v28  ;;  %v2588_v36 = vmul.f32 %v2584_v30, %v2578_v25 }
0x150a   :  { %v2591_v37 = vmul.f32 0.044715, %v2587_v31  ;;  %v2589_v55 = vmul.f32 %v2585_v32, %v2580_v56  ;;  %v3094_v31 = vld [vmem:[%s4412_s15 + $0x1] ss:$0 sm:$0xff]  ;;  %s3806_s15 = smov [#allocation8]  }
0x150b   :  { %v2594_v38 = vadd.f32 %v2590_v34, %v2574_v22  ;;  %v2592_v58 = vmul.f32 0.044715, %v2588_v36  ;;  %s2904_s25 = sshll.u32 %s3806_s15, 4  ;;  %s2905_s25 = int_to_ptr.vmem [resolvable:$true] %s2904_s25 }
0x150c   :  { %v2595_v39 = vadd.f32 %v2591_v37, %v2576_v60  ;;  %v2593_v35 = vmul.f32 0.044715, %v2589_v55  ;;  %v3095_v55 = vld [vmem:[%s4413_s16 + $0x1] ss:$0 sm:$0xff]  ;;  %s3766_s16 = scalar_lea.vmem %s2905_s25, 32  ;;  %p3771_p11 = scmp.lt.s32.totalorder %s2905_s25, %s2905_s25 }
0x150d   :  { %v2598_v40 = vmul.f32 0.7978846, %v2594_v38  ;;  %v2596_v41 = vadd.f32 %v2592_v58, %v2578_v25  ;;  %p3767_p10 = scmp.ne.s32.totalorder %s2905_s25, %s3766_s16  ;;  %p3772_p12 = scmp.lt.s32.totalorder %s3766_s16, %s3766_s16 }
0x150e   :  { %v2599_v33 = vmul.f32 0.7978846, %v2595_v39  ;;  %v2597_v42 = vadd.f32 %v2593_v35, %v2580_v56 }
0x150f   :  { %3684 = vtanh.f32 %v2598_v40  ;;  %v2600_v43 = vmul.f32 0.7978846, %v2596_v41  ;;  %v2846_v40 = vpack.c.bf16 %v2845_v24, %v2845_v24  ;;  %p3773_p13 = por %p3772_p12, %p3771_p11 }
0x1510   :  { %3686 = vtanh.f32 %v2599_v33  ;;  %v2601_v44 = vmul.f32 0.7978846, %v2597_v42 }
0x1511   :  { %3688 = vtanh.f32 %v2600_v43  ;;  %p3774_p0 = pnand %p3773_p13, %p3767_p10 }
0x1512   :  { %3690 = vtanh.f32 %v2601_v44 }
0x1519   :  { %v3685_v45 = vpop.eup %3684 }
0x151a   :  { %v3687_v46 = vpop.eup %3686  ;;  %v2606_v47 = vadd.f32 1.0, %v3685_v45 }
0x151b   :  { %v3689_v29 = vpop.eup %3688  ;;  %v2607_v48 = vadd.f32 1.0, %v3687_v46 }
0x151c   :  { %v3691_v49 = vpop.eup %3690  ;;  %v2610_v50 = vmul.f32 0.5, %v2606_v47  ;;  %v2608_v51 = vadd.f32 1.0, %v3689_v29 }
0x151d   :  { %v2609_v53 = vadd.f32 1.0, %v3691_v49  ;;  %v2611_v57 = vmul.f32 0.5, %v2607_v48 }
0x151e   :  { %v2612_v59 = vmul.f32 0.5, %v2608_v51  ;;  %v2614_v62 = vmul.f32 %v2610_v50, %v2574_v22 }
0x151f   :  { %v2613_v61 = vmul.f32 0.5, %v2609_v53  ;;  %v2615_v0 = vmul.f32 %v2611_v57, %v2576_v60 }
0x1520   :  { %v2616_v63 = vmul.f32 %v2612_v59, %v2578_v25 }
0x1521   :  { %v2617_v1 = vmul.f32 %v2613_v61, %v2580_v56 }
0x1522   :  { %v2618_v3 = vpack.c.bf16 %v2616_v63, %v2614_v62 }
0x1523   :  { %v2619_v5 = vpack.c.bf16 %v2617_v1, %v2615_v0 }
0x1525   :  { %2789 = vmatprep.mubr.bf16.mxu0 %v2619_v5 }
0x1526   :  { %2790 = vmatmul.mubr.bf16.vlgmr.msra.gmra.mrb[40].mxu0 %v2618_v3 }
0x15f9   :  { %v3203_v14 = vpop.f32.mrb[40].mxu0 }
0x15fa   :  { %v3204_v9 = vpop.f32.mrb[41].mxu0 }
0x15fb   :  { %v3205_v10 = vadd.f32 %v3204_v9, %v3203_v14  ;;  %v3206_v12 = vpop.f32.mrb[42].mxu0 }
0x15fc   :  { %v3207_v13 = vpop.f32.mrb[43].mxu0 }
0x15fd   :  { %v2792_v15 = vadd.f32 %v3205_v10, %v3075_v6  ;;  %v3208_v16 = vadd.f32 %v3207_v13, %v3206_v12 }
0x15ff   :  { %v2795_v11 = vadd.f32 %v3208_v16, %v3075_v6  ;;  %v2800_v17 = vadd.f32 %v2798_v4, %v2792_v15 }
0x1601   :  { %2806 = vadd.xlane.f32.xlu0 %v2800_v17  ;;  %v2801_v7 = vadd.f32 %v2799_v52, %v2795_v11 }
0x1603   :  { %2808 = vadd.xlane.f32.xlu1 %v2801_v7 }
0x168e   :  { %v2807_v18 = vpop.xlane.xlu0 %2806 }
0x168f   :  { %v2810_v19 = vmul.f32 0.0078125, %v2807_v18 }
0x1690   :  { %v2809_v20 = vpop.xlane.xlu1 %2808 }
0x1691   :  { %v2812_v27 = vsub.f32 %v2800_v17, %v2810_v19  ;;  %v2811_v21 = vmul.f32 0.0078125, %v2809_v20 }
0x1693   :  { %v2813_v22 = vsub.f32 %v2801_v7, %v2811_v21  ;;  %v2814_v23 = vmul.f32 %v2812_v27, %v2812_v27 }
0x1695   :  { %2816 = vadd.xlane.f32.xlu0 %v2814_v23  ;;  %v2815_v60 = vmul.f32 %v2813_v22, %v2813_v22 }
0x1697   :  { %2818 = vadd.xlane.f32.xlu1 %v2815_v60 }
0x1699   :  { %2892 = vadd.xlane.f32.xlu0 %v2891_v8 }
0x1722   :  { %v2817_v2 = vpop.xlane.xlu0 %2816 }
0x1723   :  { %v2820_v25 = vmul.f32 0.0078125, %v2817_v2 }
0x1724   :  { %v2819_v26 = vpop.xlane.xlu1 %2818 }
0x1725   :  { %v2822_v54 = vadd.f32 1e-12, %v2820_v25  ;;  %v2821_v56 = vmul.f32 0.0078125, %v2819_v26 }
0x1726   :  { %v2893_v41 = vpop.xlane.xlu0 %2892 }
0x1727   :  { %3692 = vrsqrt.f32 %v2822_v54  ;;  %v2823_v28 = vadd.f32 1e-12, %v2821_v56  ;;  %v2894_v33 = vmax.f32 %v2893_v41, 1e-09 }
0x1729   :  { %3694 = vrsqrt.f32 %v2823_v28 }
0x172a   :  { %3696 = vrcp.f32 %v2894_v33 }
0x1731   :  { %v3693_v30 = vpop.eup %3692 }
0x1732   :  { %v2826_v32 = vmul.f32 %v3693_v30, %v2812_v27 }
0x1733   :  { %v3695_v34 = vpop.eup %3694 }
0x1734   :  { %v2827_v36 = vmul.f32 %v3695_v34, %v2813_v22  ;;  %v2834_v37 = vmul.f32 %v3094_v31, %v2826_v32  ;;  %v3697_v42 = vpop.eup %3696 }
0x1736   :  { %v2835_v38 = vmul.f32 %v3094_v31, %v2827_v36  ;;  %v2842_v58 = vadd.f32 %v3095_v55, %v2834_v37 }
0x1738   :  { %v2843_v39 = vadd.f32 %v3095_v55, %v2835_v38 }
0x173a   :  { %v2844_v35 = vpack.c.bf16 %v2843_v39, %v2842_v58 }
0x173c   :  { %3388 = vmatpush3.bf16.msra.mxu1 %v2844_v35 }
0x173f   :  { %3390 = vmatmul.mubr.msk.bf16.vlgmr.msra.gmra.mrb[60].mxu1 %vm457_vm2, %v2846_v40 }
0x1812   :  { %v2884_v43 = vpop.f32.mrb[60].mxu1 }
0x1813   :  { %v2896_v44 = vmul.f32 %v3697_v42, %v2884_v43  ;;  %v3391_v45 = vpop.f32.mrb[61].mxu1 }
0x1814   :  { %v2887_v46 = vpop.f32.mrb[62].mxu1 }
0x1815   :  { %2897 = vst [vmem:[#allocation8] sm:$0x3] %v2896_v44  ;;  %v3392_v47 = vpop.f32.mrb[63].mxu1 }
0x1816   :  { %3777 = shalt.err (!%p3774_p0)
}
0x1817   :  { %s3778_s28 = scalar_lea.hbm %s4414_s17, 32 }
0x1818   :  { %p3779_p1 = scmp.ne.s32.totalorder %s4414_s17, %s3778_s28  ;;  %p3782_p2 = scmp.lt.u32.totalorder %s3778_s28, %s4414_s17 }
0x181a   :  { %p3784_p3 = pnand %p3782_p2, %p3779_p1 }
0x181c   :  { %3787 = shalt.err (!%p3784_p3)
}
0x181d   :  { %2907 = dma.vmem_to_hbm [thread:$0]  %s2905_s25, 32, %s4414_s17, [#allocation4]  }
0x181e   :  { %3792 = dma.done.wait [#allocation4], 32  }
0x181f   :  { %3793 = vsyncadd [#allocation4], 4294967264 }
0x1820   :  { %2911 = vsyncpa [#allocation3], 1 }
0x1821   :  { %2912 = vsyncpa [#allocation6], 1 }
0x1822   :  { %2913 = vsyncpa [#allocation4], 1 }

</bundles_post_ra>
